<compile_context>
chip_gen: v6e
topology: v6e:2x2x1
jax: 0.10.0
libtpu: 0.0.40
codegen_flags: <defaults>
</compile_context>

<pallas_src>
import functools
import math

import jax
import jax.numpy as jnp
from jax.experimental import pallas as pl
from jax.experimental.pallas import tpu as pltpu


def _round_up(x, m):
    return (x + m - 1) // m * m


def _equal_conv2d_kernel(x_hbm, w_ref, b_ref, o_ref, xbuf, sem, *,
                         KH, KW, stride, TH, TH_i, OW_p, W_s):
    # x_hbm : (B, H_s, s*s*W_s, C_in_p)  phase-split input, resident in HBM
    # w_ref : (KH*KW, C_in_p, TN)        scaled weight taps (grid-invariant)
    # b_ref : (1, TN)                    bias slice
    # o_ref : (TH*OW_p, TN)              lane-dense output slab for this tile
    # xbuf  : (2, TH_i, s*s*W_s, C_in_p) double-buffered halo row window
    # sem   : (2,) DMA semaphores
    b = pl.program_id(0)
    t = pl.program_id(1)
    n = pl.program_id(2)
    nT = pl.num_programs(1)
    slot = t % 2

    def fetch(tt, sl):
        pltpu.make_async_copy(
            x_hbm.at[b, pl.ds(tt * TH, TH_i)],
            xbuf.at[sl],
            sem.at[sl],
        ).start()

    # Prime the double buffer at the first row tile of every image.
    @pl.when((n == 0) & (t == 0))
    def _():
        fetch(t, slot)

    # Prefetch the next row tile of the same image while this one is computed.
    # (Row-tile axis is "arbitrary" so this sequential assumption holds.)
    @pl.when((n == 0) & (t + 1 < nT))
    def _():
        fetch(t + 1, 1 - slot)

    # Wait for this tile's window: issued just above at t==0, otherwise by the
    # prefetch of the previous row tile.  Only the first C_out tile waits; the
    # data stays in scratch for n > 0.
    @pl.when(n == 0)
    def _():
        pltpu.make_async_copy(
            x_hbm.at[b, pl.ds(t * TH, TH_i)],
            xbuf.at[slot],
            sem.at[slot],
        ).wait()

    x = xbuf[slot]                       # (TH_i, s*s*W_s, C_in_p), native dtype
    C_in_p = x.shape[-1]
    TN = o_ref.shape[-1]

    acc = jnp.zeros((TH * OW_p, TN), jnp.float32)
    for kw in range(KW):                 # static unroll over taps
        kw2, pw = divmod(kw, stride)
        for ph in range(stride):
            kh_taps = [kh for kh in range(KH) if kh % stride == ph]
            if not kh_taps:
                continue
            col0 = (ph * stride + pw) * W_s + kw2
            # One narrow (sublane) slice per (kw, phase); the kh shifts below
            # are cheap major-axis slices of this slab.
            x_w = x[:, col0:col0 + OW_p, :]          # (TH_i, OW_p, C_in_p)
            for kh in kh_taps:
                kh2 = kh // stride
                patch = x_w[kh2:kh2 + TH]            # (TH, OW_p, C_in_p)
                acc = acc + jnp.dot(
                    patch.reshape(TH * OW_p, C_in_p),   # layout-preserving:
                    w_ref[kh * KW + kw],                # OW_p % 8 == 0
                    preferred_element_type=jnp.float32)

    acc = acc + b_ref[...].astype(jnp.float32)
    o_ref[...] = acc.astype(o_ref.dtype)


def equal_conv2d_pallas(x, weight, bias=None, *, stride=1, padding=0,
                        block_h=None, vmem_limit_bytes=48 * 1024 * 1024):
    """EqualConv2d forward.

    x:      (B, C_in, H, W)   NCHW, matching the PyTorch module
    weight: (C_out, C_in, KH, KW)
    bias:   (C_out,) or None
    """
    B, C_in, H, W = x.shape
    C_out, C_in_w, KH, KW = weight.shape
    assert C_in_w == C_in
    s = int(stride)
    scale = 1.0 / math.sqrt(C_in * KH * KW)

    OH = (H + 2 * padding - KH) // s + 1
    OW = (W + 2 * padding - KW) // s + 1
    assert OH > 0 and OW > 0

    # ---- tiling geometry ----------------------------------------------------
    C_in_p = _round_up(C_in, 128)            # full MXU K tiles
    C_out_p = _round_up(C_out, 128)          # unmasked lane-dense stores
    TN = 256 if C_out_p % 256 == 0 else 128  # C_out tile
    nN = C_out_p // TN

    OW_p = _round_up(OW, 8)                  # sublane-aligned row width
    if block_h is None:
        block_h = max(1, 2048 // OW_p)       # ~2k MXU rows per tile
    TH = max(1, min(block_h, OH))            # output rows per tile
    OH_p = _round_up(OH, TH)
    nT = OH_p // TH
    TH_i = TH + (KH - 1) // s                # input rows per phase plane (halo)

    H_in = (OH_p - 1) * s + KH               # input extent the kernel reads
    W_in = (OW_p - 1) * s + KW
    H_s = -(-H_in // s)                      # per-phase plane extents
    W_s = -(-W_in // s)

    # ---- wrapper-side layout plumbing ---------------------------------------
    # NCHW -> NHWC, conv zero padding, channel padding to 128 lanes.
    x_nhwc = jnp.transpose(x, (0, 2, 3, 1))
    x_p = jnp.pad(x_nhwc, ((0, 0), (padding, padding), (padding, padding),
                           (0, C_in_p - C_in)))
    # Pad / crop to exactly (H_s*s, W_s*s) - the extent the tiled kernel reads.
    Hp, Wp = H + 2 * padding, W + 2 * padding
    x_p = jnp.pad(x_p, ((0, 0),
                        (0, max(0, H_s * s - Hp)),
                        (0, max(0, W_s * s - Wp)),
                        (0, 0)))[:, :H_s * s, :W_s * s, :]
    # Space-to-depth by the stride so every in-kernel slice is unit-stride.
    # For stride == 1 this is a no-op reshape.
    x_split = x_p.reshape(B, H_s, s, W_s, s, C_in_p)
    x_split = x_split.transpose(0, 1, 2, 4, 3, 5)
    x_split = x_split.reshape(B, H_s, s * s * W_s, C_in_p)

    # Equalized-LR scale folded into the tiny weight tensor (matches the
    # reference conv2d(x, weight * scale) formulation exactly).
    w_scaled = weight * scale
    w_t = jnp.transpose(w_scaled, (2, 3, 1, 0)).reshape(KH * KW, C_in, C_out)
    w_t = jnp.pad(w_t, ((0, 0), (0, C_in_p - C_in), (0, C_out_p - C_out)))

    b_arr = bias if bias is not None else jnp.zeros((C_out,), x.dtype)
    b_row = jnp.pad(b_arr, (0, C_out_p - C_out)).reshape(1, C_out_p)

    kernel = functools.partial(
        _equal_conv2d_kernel,
        KH=KH, KW=KW, stride=s, TH=TH, TH_i=TH_i, OW_p=OW_p, W_s=W_s)

    out_flat = pl.pallas_call(
        kernel,
        out_shape=jax.ShapeDtypeStruct((B, OH_p * OW_p, C_out_p), x.dtype),
        grid=(B, nT, nN),
        in_specs=[
            pl.BlockSpec(memory_space=pl.ANY),                        # x in HBM
            pl.BlockSpec((KH * KW, C_in_p, TN), lambda b, t, n: (0, 0, n)),
            pl.BlockSpec((1, TN), lambda b, t, n: (0, n)),
        ],
        out_specs=pl.BlockSpec((None, TH * OW_p, TN),
                               lambda b, t, n: (b, t, n)),
        scratch_shapes=[
            pltpu.VMEM((2, TH_i, s * s * W_s, C_in_p), x.dtype),
            pltpu.SemaphoreType.DMA((2,)),
        ],
        compiler_params=pltpu.CompilerParams(
            # Row-tile / C_out axes stay "arbitrary": the in-kernel prefetch
            # assumes sequential order along them.  Batch shards across cores.
            dimension_semantics=("parallel", "arbitrary", "arbitrary"),
            vmem_limit_bytes=vmem_limit_bytes,
        ),
    )(x_split, w_t, b_row)

    # (B, OH_p*OW_p, C_out_p) -> (B, C_out, OH, OW), dropping tile/lane padding.
    out = out_flat.reshape(B, OH_p, OW_p, C_out_p)[:, :OH, :OW, :C_out]
    return jnp.transpose(out, (0, 3, 1, 2))


def equal_conv2d_reference(x, weight, bias=None, *, stride=1, padding=0):
    """Pure-JAX reference mirroring the PyTorch forward (F.conv2d)."""
    C_in, KH, KW = weight.shape[1], weight.shape[2], weight.shape[3]
    scale = 1.0 / math.sqrt(C_in * KH * KW)
    out = jax.lax.conv_general_dilated(
        x, weight * scale,
        window_strides=(stride, stride),
        padding=[(padding, padding), (padding, padding)],
        dimension_numbers=("NCHW", "OIHW", "NCHW"),
        precision=jax.lax.Precision.HIGHEST)
    if bias is not None:
        out = out + bias.reshape(1, -1, 1, 1)
    return out


if __name__ == "__main__":
    key = jax.random.PRNGKey(0)
    kx, kw_, kb = jax.random.split(key, 3)

    B, C_in, H, W = 2, 4, 16, 16
    C_out, K = 8, 3
    x = jax.random.normal(kx, (B, C_in, H, W), dtype=jnp.float32)
    weight = jax.random.normal(kw_, (C_out, C_in, K, K), dtype=jnp.float32)
    # Module init is zero bias; use nonzero so the bias path is really tested.
    bias = jax.random.normal(kb, (C_out,), dtype=jnp.float32) * 0.1

    # Tolerance accounts for TPU matmuls using bf16 MXU passes for f32 inputs.
    TOL = dict(atol=2e-2, rtol=2e-2)

    # Case 1: 3x3, stride=1, padding=1 (standard StyleGAN2 conv).
    out = equal_conv2d_pallas(x, weight, bias, stride=1, padding=1, block_h=8)
    out = jax.block_until_ready(out)
    ref = equal_conv2d_reference(x, weight, bias, stride=1, padding=1)
    assert out.shape == ref.shape == (B, C_out, H, W)
    assert jnp.allclose(out, ref, **TOL), "stride=1 mismatch vs reference"

    # Case 2: 3x3, stride=2, padding=1 (discriminator downsample conv).
    out2 = equal_conv2d_pallas(x, weight, bias, stride=2, padding=1, block_h=4)
    out2 = jax.block_until_ready(out2)
    ref2 = equal_conv2d_reference(x, weight, bias, stride=2, padding=1)
    assert out2.shape == ref2.shape
    assert jnp.allclose(out2, ref2, **TOL), "stride=2 mismatch vs reference"

    print("KERNEL_OK")
</pallas_src>

<mosaic_0001>
module attributes {stable_mosaic.version = 11 : i64} {
  func.func @_equal_conv2d_kernel(%arg0: i32, %arg1: i32, %arg2: i32, %arg3: memref<2x18x18x128xf32, #tpu.memory_space<any>>, %arg4: memref<9x128x128xf32, #tpu.memory_space<vmem>>, %arg5: memref<1x128xf32, #tpu.memory_space<vmem>>, %arg6: memref<1x128x128xf32, #tpu.memory_space<vmem>>, %arg7: memref<2x10x18x128xf32, #tpu.memory_space<vmem>>, %arg8: memref<2x!tpu.dma_semaphore, #tpu.memory_space<semaphore_mem>>) attributes {dimension_semantics = [#tpu.dimension_semantics<parallel>, #tpu.dimension_semantics<arbitrary>, #tpu.dimension_semantics<arbitrary>], iteration_bounds = array<i64: 2, 2, 1>, scalar_prefetch = 0 : i64, scratch_operands = 2 : i64, tpu.core_type = #tpu.core_type<tc>, window_params = [{}, {transform_indices = @transform_1, window_bounds = array<i64: 9, 128, 128>}, {transform_indices = @transform_2, window_bounds = array<i64: 1, 128>}, {transform_indices = @transform_3, window_bounds = array<i64: 1, 128, 128>}]} {
    %c2_i32 = arith.constant 2 : i32
    %c0_i32 = arith.constant 0 : i32
    %0 = arith.cmpi eq, %c2_i32, %c0_i32 : i32
    %c1_i32 = arith.constant 1 : i32
    %1 = arith.select %0, %c1_i32, %c2_i32 : i32
    %2 = arith.remsi %arg1, %1 : i32
    %c0_i32_0 = arith.constant 0 : i32
    %3 = arith.cmpi ne, %2, %c0_i32_0 : i32
    %c0_i32_1 = arith.constant 0 : i32
    %4 = arith.cmpi slt, %2, %c0_i32_1 : i32
    %c0_i32_2 = arith.constant 0 : i32
    %5 = arith.cmpi slt, %1, %c0_i32_2 : i32
    %6 = arith.xori %4, %5 : i1
    %7 = arith.andi %6, %3 : i1
    %8 = arith.addi %2, %1 : i32
    %9 = arith.select %7, %8, %2 : i32
    %c0_i32_3 = arith.constant 0 : i32
    %10 = arith.cmpi eq, %arg2, %c0_i32_3 : i32
    %c0_i32_4 = arith.constant 0 : i32
    %11 = arith.cmpi eq, %arg1, %c0_i32_4 : i32
    %12 = arith.andi %10, %11 : i1
    %13 = arith.extui %12 : i1 to i32
    %c0_i32_5 = arith.constant 0 : i32
    %14 = arith.cmpi ne, %13, %c0_i32_5 : i32
    scf.if %14 {
      %c8_i32 = arith.constant 8 : i32
      %91 = arith.muli %arg1, %c8_i32 : i32
      %c0_i32_47 = arith.constant 0 : i32
      %c0_i32_48 = arith.constant 0 : i32
      %92 = tpu.memref_slice %arg3[%arg0, %91, %c0_i32_47, %c0_i32_48] : memref<2x18x18x128xf32, #tpu.memory_space<any>> -> memref<1x10x18x128xf32, #tpu.memory_space<any>>
      %93 = tpu.memref_squeeze %92 : memref<1x10x18x128xf32, #tpu.memory_space<any>> -> memref<10x18x128xf32, #tpu.memory_space<any>>
      %c0_i32_49 = arith.constant 0 : i32
      %c0_i32_50 = arith.constant 0 : i32
      %c0_i32_51 = arith.constant 0 : i32
      %94 = tpu.memref_slice %arg7[%9, %c0_i32_49, %c0_i32_50, %c0_i32_51] : memref<2x10x18x128xf32, #tpu.memory_space<vmem>> -> memref<1x10x18x128xf32, #tpu.memory_space<vmem>>
      %95 = tpu.memref_squeeze %94 : memref<1x10x18x128xf32, #tpu.memory_space<vmem>> -> memref<10x18x128xf32, #tpu.memory_space<vmem>>
      %96 = tpu.memref_slice %arg8[%9] : memref<2x!tpu.dma_semaphore, #tpu.memory_space<semaphore_mem>> -> memref<1x!tpu.dma_semaphore, #tpu.memory_space<semaphore_mem>>
      %97 = tpu.memref_squeeze %96 : memref<1x!tpu.dma_semaphore, #tpu.memory_space<semaphore_mem>> -> memref<!tpu.dma_semaphore, #tpu.memory_space<semaphore_mem>>
      tpu.enqueue_dma source(%93 : memref<10x18x128xf32, #tpu.memory_space<any>>) target(%95 : memref<10x18x128xf32, #tpu.memory_space<vmem>>) target_semaphore(%97 : memref<!tpu.dma_semaphore, #tpu.memory_space<semaphore_mem>>)
    } else {
    }
    %c0_i32_6 = arith.constant 0 : i32
    %15 = arith.cmpi eq, %arg2, %c0_i32_6 : i32
    %c1_i32_7 = arith.constant 1 : i32
    %16 = arith.addi %arg1, %c1_i32_7 : i32
    %c2_i32_8 = arith.constant 2 : i32
    %17 = arith.cmpi slt, %16, %c2_i32_8 : i32
    %18 = arith.andi %15, %17 : i1
    %19 = arith.extui %18 : i1 to i32
    %c0_i32_9 = arith.constant 0 : i32
    %20 = arith.cmpi ne, %19, %c0_i32_9 : i32
    scf.if %20 {
      %c1_i32_47 = arith.constant 1 : i32
      %91 = arith.addi %arg1, %c1_i32_47 : i32
      %c1_i32_48 = arith.constant 1 : i32
      %92 = arith.subi %c1_i32_48, %9 : i32
      %c8_i32 = arith.constant 8 : i32
      %93 = arith.muli %91, %c8_i32 : i32
      %c0_i32_49 = arith.constant 0 : i32
      %c0_i32_50 = arith.constant 0 : i32
      %94 = tpu.memref_slice %arg3[%arg0, %93, %c0_i32_49, %c0_i32_50] : memref<2x18x18x128xf32, #tpu.memory_space<any>> -> memref<1x10x18x128xf32, #tpu.memory_space<any>>
      %95 = tpu.memref_squeeze %94 : memref<1x10x18x128xf32, #tpu.memory_space<any>> -> memref<10x18x128xf32, #tpu.memory_space<any>>
      %c0_i32_51 = arith.constant 0 : i32
      %c0_i32_52 = arith.constant 0 : i32
      %c0_i32_53 = arith.constant 0 : i32
      %96 = tpu.memref_slice %arg7[%92, %c0_i32_51, %c0_i32_52, %c0_i32_53] : memref<2x10x18x128xf32, #tpu.memory_space<vmem>> -> memref<1x10x18x128xf32, #tpu.memory_space<vmem>>
      %97 = tpu.memref_squeeze %96 : memref<1x10x18x128xf32, #tpu.memory_space<vmem>> -> memref<10x18x128xf32, #tpu.memory_space<vmem>>
      %98 = tpu.memref_slice %arg8[%92] : memref<2x!tpu.dma_semaphore, #tpu.memory_space<semaphore_mem>> -> memref<1x!tpu.dma_semaphore, #tpu.memory_space<semaphore_mem>>
      %99 = tpu.memref_squeeze %98 : memref<1x!tpu.dma_semaphore, #tpu.memory_space<semaphore_mem>> -> memref<!tpu.dma_semaphore, #tpu.memory_space<semaphore_mem>>
      tpu.enqueue_dma source(%95 : memref<10x18x128xf32, #tpu.memory_space<any>>) target(%97 : memref<10x18x128xf32, #tpu.memory_space<vmem>>) target_semaphore(%99 : memref<!tpu.dma_semaphore, #tpu.memory_space<semaphore_mem>>)
    } else {
    }
    %c0_i32_10 = arith.constant 0 : i32
    %21 = arith.cmpi eq, %arg2, %c0_i32_10 : i32
    %22 = arith.extui %21 : i1 to i32
    %c0_i32_11 = arith.constant 0 : i32
    %23 = arith.cmpi ne, %22, %c0_i32_11 : i32
    scf.if %23 {
      %c8_i32 = arith.constant 8 : i32
      %91 = arith.muli %arg1, %c8_i32 : i32
      %c0_i32_47 = arith.constant 0 : i32
      %c0_i32_48 = arith.constant 0 : i32
      %92 = tpu.memref_slice %arg3[%arg0, %91, %c0_i32_47, %c0_i32_48] : memref<2x18x18x128xf32, #tpu.memory_space<any>> -> memref<1x10x18x128xf32, #tpu.memory_space<any>>
      %93 = tpu.memref_squeeze %92 : memref<1x10x18x128xf32, #tpu.memory_space<any>> -> memref<10x18x128xf32, #tpu.memory_space<any>>
      %c0_i32_49 = arith.constant 0 : i32
      %c0_i32_50 = arith.constant 0 : i32
      %c0_i32_51 = arith.constant 0 : i32
      %94 = tpu.memref_slice %arg7[%9, %c0_i32_49, %c0_i32_50, %c0_i32_51] : memref<2x10x18x128xf32, #tpu.memory_space<vmem>> -> memref<1x10x18x128xf32, #tpu.memory_space<vmem>>
      %95 = tpu.memref_squeeze %94 : memref<1x10x18x128xf32, #tpu.memory_space<vmem>> -> memref<10x18x128xf32, #tpu.memory_space<vmem>>
      %96 = tpu.memref_slice %arg8[%9] : memref<2x!tpu.dma_semaphore, #tpu.memory_space<semaphore_mem>> -> memref<1x!tpu.dma_semaphore, #tpu.memory_space<semaphore_mem>>
      %97 = tpu.memref_squeeze %96 : memref<1x!tpu.dma_semaphore, #tpu.memory_space<semaphore_mem>> -> memref<!tpu.dma_semaphore, #tpu.memory_space<semaphore_mem>>
      tpu.wait_dma2 semaphore(%97 : memref<!tpu.dma_semaphore, #tpu.memory_space<semaphore_mem>>) src(%93 : memref<10x18x128xf32, #tpu.memory_space<any>>) dst(%95 : memref<10x18x128xf32, #tpu.memory_space<vmem>>)
    } else {
    }
    %24 = arith.index_cast %9 : i32 to index
    %c0 = arith.constant 0 : index
    %c0_12 = arith.constant 0 : index
    %c0_13 = arith.constant 0 : index
    %25 = vector.load %arg7[%24, %c0, %c0_12, %c0_13] : memref<2x10x18x128xf32, #tpu.memory_space<vmem>>, vector<1x10x18x128xf32>
    %26 = vector.shape_cast %25 : vector<1x10x18x128xf32> to vector<10x18x128xf32>
    %cst = arith.constant 0.000000e+00 : f32
    %27 = vector.broadcast %cst : f32 to vector<128x128xf32>
    %28 = vector.extract_strided_slice %26 {offsets = [0, 0, 0], sizes = [10, 16, 128], strides = [1, 1, 1]} : vector<10x18x128xf32> to vector<10x16x128xf32>
    %29 = vector.extract_strided_slice %28 {offsets = [0, 0, 0], sizes = [8, 16, 128], strides = [1, 1, 1]} : vector<10x16x128xf32> to vector<8x16x128xf32>
    %30 = vector.shape_cast %29 : vector<8x16x128xf32> to vector<128x128xf32>
    %c0_14 = arith.constant 0 : index
    %c0_15 = arith.constant 0 : index
    %c0_16 = arith.constant 0 : index
    %31 = vector.load %arg4[%c0_14, %c0_15, %c0_16] : memref<9x128x128xf32, #tpu.memory_space<vmem>>, vector<1x128x128xf32>
    %32 = vector.shape_cast %31 : vector<1x128x128xf32> to vector<128x128xf32>
    %cst_17 = arith.constant dense<0.000000e+00> : vector<128x128xf32>
    %33 = tpu.matmul %30, %32, %cst_17 {dimension_numbers = #tpu.dot_dimension_numbers<[1], [0], [0], [1], [0, 0, 1, 1], [], []>} : vector<128x128xf32>, vector<128x128xf32>, vector<128x128xf32> -> vector<128x128xf32>
    %34 = arith.addf %27, %33 : vector<128x128xf32>
    %35 = vector.extract_strided_slice %28 {offsets = [1, 0, 0], sizes = [8, 16, 128], strides = [1, 1, 1]} : vector<10x16x128xf32> to vector<8x16x128xf32>
    %36 = vector.shape_cast %35 : vector<8x16x128xf32> to vector<128x128xf32>
    %c3 = arith.constant 3 : index
    %c0_18 = arith.constant 0 : index
    %c0_19 = arith.constant 0 : index
    %37 = vector.load %arg4[%c3, %c0_18, %c0_19] : memref<9x128x128xf32, #tpu.memory_space<vmem>>, vector<1x128x128xf32>
    %38 = vector.shape_cast %37 : vector<1x128x128xf32> to vector<128x128xf32>
    %cst_20 = arith.constant dense<0.000000e+00> : vector<128x128xf32>
    %39 = tpu.matmul %36, %38, %cst_20 {dimension_numbers = #tpu.dot_dimension_numbers<[1], [0], [0], [1], [0, 0, 1, 1], [], []>} : vector<128x128xf32>, vector<128x128xf32>, vector<128x128xf32> -> vector<128x128xf32>
    %40 = arith.addf %34, %39 : vector<128x128xf32>
    %41 = vector.extract_strided_slice %28 {offsets = [2, 0, 0], sizes = [8, 16, 128], strides = [1, 1, 1]} : vector<10x16x128xf32> to vector<8x16x128xf32>
    %42 = vector.shape_cast %41 : vector<8x16x128xf32> to vector<128x128xf32>
    %c6 = arith.constant 6 : index
    %c0_21 = arith.constant 0 : index
    %c0_22 = arith.constant 0 : index
    %43 = vector.load %arg4[%c6, %c0_21, %c0_22] : memref<9x128x128xf32, #tpu.memory_space<vmem>>, vector<1x128x128xf32>
    %44 = vector.shape_cast %43 : vector<1x128x128xf32> to vector<128x128xf32>
    %cst_23 = arith.constant dense<0.000000e+00> : vector<128x128xf32>
    %45 = tpu.matmul %42, %44, %cst_23 {dimension_numbers = #tpu.dot_dimension_numbers<[1], [0], [0], [1], [0, 0, 1, 1], [], []>} : vector<128x128xf32>, vector<128x128xf32>, vector<128x128xf32> -> vector<128x128xf32>
    %46 = arith.addf %40, %45 : vector<128x128xf32>
    %47 = vector.extract_strided_slice %26 {offsets = [0, 1, 0], sizes = [10, 16, 128], strides = [1, 1, 1]} : vector<10x18x128xf32> to vector<10x16x128xf32>
    %48 = vector.extract_strided_slice %47 {offsets = [0, 0, 0], sizes = [8, 16, 128], strides = [1, 1, 1]} : vector<10x16x128xf32> to vector<8x16x128xf32>
    %49 = vector.shape_cast %48 : vector<8x16x128xf32> to vector<128x128xf32>
    %c1 = arith.constant 1 : index
    %c0_24 = arith.constant 0 : index
    %c0_25 = arith.constant 0 : index
    %50 = vector.load %arg4[%c1, %c0_24, %c0_25] : memref<9x128x128xf32, #tpu.memory_space<vmem>>, vector<1x128x128xf32>
    %51 = vector.shape_cast %50 : vector<1x128x128xf32> to vector<128x128xf32>
    %cst_26 = arith.constant dense<0.000000e+00> : vector<128x128xf32>
    %52 = tpu.matmul %49, %51, %cst_26 {dimension_numbers = #tpu.dot_dimension_numbers<[1], [0], [0], [1], [0, 0, 1, 1], [], []>} : vector<128x128xf32>, vector<128x128xf32>, vector<128x128xf32> -> vector<128x128xf32>
    %53 = arith.addf %46, %52 : vector<128x128xf32>
    %54 = vector.extract_strided_slice %47 {offsets = [1, 0, 0], sizes = [8, 16, 128], strides = [1, 1, 1]} : vector<10x16x128xf32> to vector<8x16x128xf32>
    %55 = vector.shape_cast %54 : vector<8x16x128xf32> to vector<128x128xf32>
    %c4 = arith.constant 4 : index
    %c0_27 = arith.constant 0 : index
    %c0_28 = arith.constant 0 : index
    %56 = vector.load %arg4[%c4, %c0_27, %c0_28] : memref<9x128x128xf32, #tpu.memory_space<vmem>>, vector<1x128x128xf32>
    %57 = vector.shape_cast %56 : vector<1x128x128xf32> to vector<128x128xf32>
    %cst_29 = arith.constant dense<0.000000e+00> : vector<128x128xf32>
    %58 = tpu.matmul %55, %57, %cst_29 {dimension_numbers = #tpu.dot_dimension_numbers<[1], [0], [0], [1], [0, 0, 1, 1], [], []>} : vector<128x128xf32>, vector<128x128xf32>, vector<128x128xf32> -> vector<128x128xf32>
    %59 = arith.addf %53, %58 : vector<128x128xf32>
    %60 = vector.extract_strided_slice %47 {offsets = [2, 0, 0], sizes = [8, 16, 128], strides = [1, 1, 1]} : vector<10x16x128xf32> to vector<8x16x128xf32>
    %61 = vector.shape_cast %60 : vector<8x16x128xf32> to vector<128x128xf32>
    %c7 = arith.constant 7 : index
    %c0_30 = arith.constant 0 : index
    %c0_31 = arith.constant 0 : index
    %62 = vector.load %arg4[%c7, %c0_30, %c0_31] : memref<9x128x128xf32, #tpu.memory_space<vmem>>, vector<1x128x128xf32>
    %63 = vector.shape_cast %62 : vector<1x128x128xf32> to vector<128x128xf32>
    %cst_32 = arith.constant dense<0.000000e+00> : vector<128x128xf32>
    %64 = tpu.matmul %61, %63, %cst_32 {dimension_numbers = #tpu.dot_dimension_numbers<[1], [0], [0], [1], [0, 0, 1, 1], [], []>} : vector<128x128xf32>, vector<128x128xf32>, vector<128x128xf32> -> vector<128x128xf32>
    %65 = arith.addf %59, %64 : vector<128x128xf32>
    %66 = vector.extract_strided_slice %26 {offsets = [0, 2, 0], sizes = [10, 16, 128], strides = [1, 1, 1]} : vector<10x18x128xf32> to vector<10x16x128xf32>
    %67 = vector.extract_strided_slice %66 {offsets = [0, 0, 0], sizes = [8, 16, 128], strides = [1, 1, 1]} : vector<10x16x128xf32> to vector<8x16x128xf32>
    %68 = vector.shape_cast %67 : vector<8x16x128xf32> to vector<128x128xf32>
    %c2 = arith.constant 2 : index
    %c0_33 = arith.constant 0 : index
    %c0_34 = arith.constant 0 : index
    %69 = vector.load %arg4[%c2, %c0_33, %c0_34] : memref<9x128x128xf32, #tpu.memory_space<vmem>>, vector<1x128x128xf32>
    %70 = vector.shape_cast %69 : vector<1x128x128xf32> to vector<128x128xf32>
    %cst_35 = arith.constant dense<0.000000e+00> : vector<128x128xf32>
    %71 = tpu.matmul %68, %70, %cst_35 {dimension_numbers = #tpu.dot_dimension_numbers<[1], [0], [0], [1], [0, 0, 1, 1], [], []>} : vector<128x128xf32>, vector<128x128xf32>, vector<128x128xf32> -> vector<128x128xf32>
    %72 = arith.addf %65, %71 : vector<128x128xf32>
    %73 = vector.extract_strided_slice %66 {offsets = [1, 0, 0], sizes = [8, 16, 128], strides = [1, 1, 1]} : vector<10x16x128xf32> to vector<8x16x128xf32>
    %74 = vector.shape_cast %73 : vector<8x16x128xf32> to vector<128x128xf32>
    %c5 = arith.constant 5 : index
    %c0_36 = arith.constant 0 : index
    %c0_37 = arith.constant 0 : index
    %75 = vector.load %arg4[%c5, %c0_36, %c0_37] : memref<9x128x128xf32, #tpu.memory_space<vmem>>, vector<1x128x128xf32>
    %76 = vector.shape_cast %75 : vector<1x128x128xf32> to vector<128x128xf32>
    %cst_38 = arith.constant dense<0.000000e+00> : vector<128x128xf32>
    %77 = tpu.matmul %74, %76, %cst_38 {dimension_numbers = #tpu.dot_dimension_numbers<[1], [0], [0], [1], [0, 0, 1, 1], [], []>} : vector<128x128xf32>, vector<128x128xf32>, vector<128x128xf32> -> vector<128x128xf32>
    %78 = arith.addf %72, %77 : vector<128x128xf32>
    %79 = vector.extract_strided_slice %66 {offsets = [2, 0, 0], sizes = [8, 16, 128], strides = [1, 1, 1]} : vector<10x16x128xf32> to vector<8x16x128xf32>
    %80 = vector.shape_cast %79 : vector<8x16x128xf32> to vector<128x128xf32>
    %c8 = arith.constant 8 : index
    %c0_39 = arith.constant 0 : index
    %c0_40 = arith.constant 0 : index
    %81 = vector.load %arg4[%c8, %c0_39, %c0_40] : memref<9x128x128xf32, #tpu.memory_space<vmem>>, vector<1x128x128xf32>
    %82 = vector.shape_cast %81 : vector<1x128x128xf32> to vector<128x128xf32>
    %cst_41 = arith.constant dense<0.000000e+00> : vector<128x128xf32>
    %83 = tpu.matmul %80, %82, %cst_41 {dimension_numbers = #tpu.dot_dimension_numbers<[1], [0], [0], [1], [0, 0, 1, 1], [], []>} : vector<128x128xf32>, vector<128x128xf32>, vector<128x128xf32> -> vector<128x128xf32>
    %84 = arith.addf %78, %83 : vector<128x128xf32>
    %c0_42 = arith.constant 0 : index
    %c0_43 = arith.constant 0 : index
    %85 = vector.load %arg5[%c0_42, %c0_43] : memref<1x128xf32, #tpu.memory_space<vmem>>, vector<1x128xf32>
    %86 = vector.broadcast %85 : vector<1x128xf32> to vector<128x128xf32>
    %87 = arith.addf %84, %86 : vector<128x128xf32>
    %c0_44 = arith.constant 0 : index
    %c0_45 = arith.constant 0 : index
    %c0_46 = arith.constant 0 : index
    %88 = vector.load %arg6[%c0_44, %c0_45, %c0_46] : memref<1x128x128xf32, #tpu.memory_space<vmem>>, vector<1x128x128xf32>
    %89 = vector.shape_cast %88 : vector<1x128x128xf32> to vector<128x128xf32>
    %90 = vector.shape_cast %87 : vector<128x128xf32> to vector<1x128x128xf32>
    tpu.vector_store %arg6[%c0_44, %c0_45, %c0_46], %90 {strides = array<i32>} : memref<1x128x128xf32, #tpu.memory_space<vmem>>, vector<1x128x128xf32>,
    return
  }
  func.func @transform_1(%arg0: i32, %arg1: i32, %arg2: i32) -> (i32, i32, i32) {
    %c0_i32 = arith.constant 0 : i32
    %c0_i32_0 = arith.constant 0 : i32
    %c0_i32_1 = arith.constant 0 : i32
    return %c0_i32, %c0_i32_0, %arg2 : i32, i32, i32
  }
  func.func @transform_2(%arg0: i32, %arg1: i32, %arg2: i32) -> (i32, i32) {
    %c0_i32 = arith.constant 0 : i32
    %c0_i32_0 = arith.constant 0 : i32
    return %c0_i32, %arg2 : i32, i32
  }
  func.func @transform_3(%arg0: i32, %arg1: i32, %arg2: i32) -> (i32, i32, i32) {
    %c0_i32 = arith.constant 0 : i32
    return %arg0, %arg1, %arg2 : i32, i32, i32
  }
}

</mosaic_0001>

<bundles_post_ra>
// kernel: tpu_custom_call.1
= control target key start
LH: loop header
LB: loop body
LE: loop exit
PB: predicated region body
PF: predicated region fallthrough
CT: control target
= control target key end

     0   :  { %8 = vsyncpa [#allocation5], 0  ;;  %s5004_s0 = inlined_call_operand.vmem [shape: f32[2,18,18,128], index: 0, kind: input, shape index: {}]   ;;  %s5005_s1 = inlined_call_operand.vmem [shape: f32[9,128,128], index: 1, kind: input, shape index: {}]   ;;  %s5006_s2 = inlined_call_operand.vmem [shape: f32[1,128], index: 2, kind: input, shape index: {}]   ;;  %s5007_s3 = inlined_call_operand.hbm [shape: f32[2,256,128], index: 3, kind: output, shape index: {}]  }
   0x1   :  { %10 = vsyncpa [#allocation5 + $0x1], 0  ;;  %s3715_s12 = smov 0   ;;  %s3717_s13 = smov 0  }
   0x2   :  { %s3719_s14 = smov 0   ;;  %s3721_s15 = smov 0  }
   0x3   :  { %s3723_s16 = smov 0   ;;  %s3725_s17 = smov 0  }
   0x4   :  { %s3727_s18 = smov 0   ;;  %s3729_s19 = smov 0  }
   0x5 LB: > { %s2471_s20 = sadd.s32 4294967295, %s3690_s19   ;;  %s2472_s21 = sadd.s32 4294967294, %s3690_s19   ;;  %s3690_s19 = sphi %s3729_s19, %s16_s19   ;;  %s3686_s18 = sphi %s3727_s18, %s5054_s18   ;;  %s3682_s17 = sphi %s3725_s17, %s5053_s17   ;;  %s3678_s16 = sphi %s3723_s16, %s5052_s16   ;;  %s3674_s15 = sphi %s3721_s15, %s5051_s15   ;;  %s3670_s14 = sphi %s3719_s14, %s5050_s14   ;;  %s3666_s13 = sphi %s3717_s13, %s5049_s13   ;;  %s3662_s12 = sphi %s3715_s12, %s5048_s12  }
   0x6   : > { %s31_s22 = sadd.s32 1, %s3682_s17  ;;  %s35_s23 = sadd.s32 1, %s3686_s18 }
   0x7   : > { %p33_p0 = scmp.ge.s32.totalorder %s31_s22, 2  ;;  %p108_p1 = scmp.ne.s32.totalorder %s3670_s14, %s3666_s13 }
   0x8   : > { %p109_p2 = scmp.eq.s32.totalorder %s2471_s20, 3  ;;  %p114_p5 = scmp.ne.s32.totalorder %s3666_s13, %s3662_s12 }
   0x9   : > { %s5056_s22 = smov (%p33_p0, %s31_s22), 0  ;;  %s5058_s23 = smov (!%p33_p0, %s35_s23), %s3686_s18 }
   0xa   : > { %s92_s24 = ssub.s32 %s3682_s17, %s5056_s22  ;;  %p3766_p3 = por %p109_p2, %p108_p1 }
   0xb   : > { %p37_p4 = scmp.ge.s32.totalorder %s5058_s23, 2  ;;  %p115_p6 = scmp.eq.s32.totalorder %s2472_s21, 3 }
   0xc   : > { %p2476_p7 = scmp.ge.s32.totalorder %s3690_s19, 1  ;;  %p146_p9 = scmp.lt.s32.totalorder %s3690_s19, 5 }
   0xd   : > { %s5060_s23 = smov (%p37_p4, %s5058_s23), 0  ;;  %p3775_p8 = por %p115_p6, %p114_p5 }
   0xe   : > { %s91_s27 = ssub.s32 %s3686_s18, %s5060_s23  ;;  %s98_s28 = sadd.s32 1, %s3670_s14 }
   0xf   : > { %s93_s29 = sor.u32 %s92_s24, %s91_s27  ;;  %p147_p10 = pnand %p2476_p7, %p146_p9 }
  0x10   : > { %p96_p11 = scmp.eq.s32.totalorder %s93_s29, 0 }
  0x11   : > { %150 = sbr.rel (%p147_p10) target bundleno = 531 (0x213), region = 28 }
  0x12   : > { %s3784_s30 = scalar_select %p96_p11, %s3670_s14, %s98_s28  }
  0x16   : > { %s167_s4 = sand.u32 1, %s3666_s13   ;;  %p178_p12 = scmp.lt.s32.totalorder %s3674_s15, 0 }
  0x17   : > { %s2477_s5 = sshll.u32 %s167_s4, 7  ;;  %s179_s6 = ssub.s32 0, %s3674_s15 }
  0x18   : > { %s2478_s7 = smin.u32 %s3674_s15, %s179_s6  ;;  %p191_p13 = scmp.eq.s32.totalorder %s3674_s15, 0 }
  0x19   : > { %s181_s8 = sand.u32 1, %s2478_s7   ;;  %s3795_s11 = scalar_lea.vmem [#allocation4], %s2477_s5 }
  0x1a   : > { %s182_s9 = ssub.s32 0, %s181_s8  ;;  %195 = sbr.rel (!%p191_p13) target bundleno = 51 (0x33), region = 32 }
  0x1b   : > { %s5062_s9 = smov (!%p178_p12, %s182_s9), %s181_s8  ;;  %s2483_s20 = smul.u32 (%p191_p13), 192, %s3674_s15 }
  0x1c   : > { %p2480_p0 = scmp.lt.s32.totalorder %s5062_s9, 0  ;;  %s188_s10 = sadd.s32 2, %s5062_s9 }
  0x1d   : > { %s198_s21 = smul.u32 (%p191_p13), 432, %s3678_s16 }
  0x1e   : > { %s5064_s10 = smov (!%p2480_p0, %s188_s10), %s5062_s9 }
  0x1f   : > { %s201_s24 = smul.u32 240, %s5064_s10  ;;  %s199_s27 = sadd.s32 %s2483_s20, %s198_s21 }
  0x20   : > { %s3803_s6 = scalar_lea.vmem %s5004_s0, %s199_s27  ;;  %s203_s7 = scalar_lea.sflag [#allocation3], %s5064_s10 }
  0x21   : > { %v260_v0 = vld [vmem:[%s3803_s6] sm:$0xff]  ;;  %v262_v1 = vld [vmem:[%s3803_s6 + $0x8] sm:$0xff]  ;;  %v264_v2 = vld [vmem:[%s3803_s6 + $0x18] sm:$0xff]  ;;  %s3808_s5 = scalar_lea.vmem [#allocation2], %s201_s24 }
  0x22   : > { %261 = vst [vmem:[%s3808_s5] sm:$0xff] %v260_v0  ;;  %263 = vst [vmem:[%s3808_s5 + $0x8] sm:$0xff] %v262_v1  ;;  %v266_v3 = vld [vmem:[%s3803_s6 + $0x20] sm:$0xff]  ;;  %v268_v4 = vld [vmem:[%s3803_s6 + $0x30] sm:$0xff] }
  0x23   : > { %265 = vst [vmem:[%s3808_s5 + $0x18] sm:$0xff] %v264_v2  ;;  %v270_v5 = vld [vmem:[%s3803_s6 + $0x38] sm:$0xff]  ;;  %267 = vst [vmem:[%s3808_s5 + $0x20] sm:$0xff] %v266_v3  ;;  %v272_v6 = vld [vmem:[%s3803_s6 + $0x48] sm:$0xff] }
  0x24   : > { %269 = vst [vmem:[%s3808_s5 + $0x30] sm:$0xff] %v268_v4  ;;  %271 = vst [vmem:[%s3808_s5 + $0x38] sm:$0xff] %v270_v5  ;;  %v274_v7 = vld [vmem:[%s3803_s6 + $0x50] sm:$0xff]  ;;  %v276_v8 = vld [vmem:[%s3803_s6 + $0x60] sm:$0xff] }
  0x25   : > { %273 = vst [vmem:[%s3808_s5 + $0x48] sm:$0xff] %v272_v6  ;;  %275 = vst [vmem:[%s3808_s5 + $0x50] sm:$0xff] %v274_v7  ;;  %v278_v9 = vld [vmem:[%s3803_s6 + $0x68] sm:$0xff]  ;;  %v280_v10 = vld [vmem:[%s3803_s6 + $0x78] sm:$0xff] }
  0x26   : > { %277 = vst [vmem:[%s3808_s5 + $0x60] sm:$0xff] %v276_v8  ;;  %v282_v11 = vld [vmem:[%s3803_s6 + $0x80] sm:$0xff]  ;;  %279 = vst [vmem:[%s3808_s5 + $0x68] sm:$0xff] %v278_v9  ;;  %v284_v12 = vld [vmem:[%s3803_s6 + $0x90] sm:$0xff] }
  0x27   : > { %281 = vst [vmem:[%s3808_s5 + $0x78] sm:$0xff] %v280_v10  ;;  %283 = vst [vmem:[%s3808_s5 + $0x80] sm:$0xff] %v282_v11  ;;  %v286_v13 = vld [vmem:[%s3803_s6 + $0x98] sm:$0xff]  ;;  %v288_v14 = vld [vmem:[%s3803_s6 + $0xa8] sm:$0xff] }
  0x28   : > { %285 = vst [vmem:[%s3808_s5 + $0x90] sm:$0xff] %v284_v12  ;;  %287 = vst [vmem:[%s3808_s5 + $0x98] sm:$0xff] %v286_v13  ;;  %v290_v15 = vld [vmem:[%s3803_s6 + $0xb0] sm:$0xff]  ;;  %v292_v16 = vld [vmem:[%s3803_s6 + $0xc0] sm:$0xff] }
  0x29   : > { %289 = vst [vmem:[%s3808_s5 + $0xa8] sm:$0xff] %v288_v14  ;;  %v294_v17 = vld [vmem:[%s3803_s6 + $0xc8] sm:$0xff]  ;;  %291 = vst [vmem:[%s3808_s5 + $0xb0] sm:$0xff] %v290_v15  ;;  %v296_v18 = vld [vmem:[%s3803_s6 + $0xd8] sm:$0xff] }
  0x2a   : > { %293 = vst [vmem:[%s3808_s5 + $0xc0] sm:$0xff] %v292_v16  ;;  %295 = vst [vmem:[%s3808_s5 + $0xc8] sm:$0xff] %v294_v17  ;;  %v298_v19 = vld [vmem:[%s3803_s6 + $0xe0] sm:$0xff]  ;;  %v2484_v20 = vld [vmem:[%s3803_s6 + $0x10] sm:$0x3] }
  0x2b   : > { %297 = vst [vmem:[%s3808_s5 + $0xd8] sm:$0xff] %v296_v18  ;;  %299 = vst [vmem:[%s3808_s5 + $0xe0] sm:$0xff] %v298_v19  ;;  %v2486_v21 = vld [vmem:[%s3803_s6 + $0x28] sm:$0x3]  ;;  %v2488_v22 = vld [vmem:[%s3803_s6 + $0x40] sm:$0x3] }
  0x2c   : > { %2485 = vst [vmem:[%s3808_s5 + $0x10] sm:$0x3] %v2484_v20  ;;  %v2490_v23 = vld [vmem:[%s3803_s6 + $0x58] sm:$0x3]  ;;  %2487 = vst [vmem:[%s3808_s5 + $0x28] sm:$0x3] %v2486_v21 }
  0x2d   : > { %2489 = vst [vmem:[%s3808_s5 + $0x40] sm:$0x3] %v2488_v22  ;;  %2491 = vst [vmem:[%s3808_s5 + $0x58] sm:$0x3] %v2490_v23  ;;  %v2492_v24 = vld [vmem:[%s3803_s6 + $0x70] sm:$0x3] }
  0x2e   : > { %v2494_v25 = vld [vmem:[%s3803_s6 + $0x88] sm:$0x3]  ;;  %v2496_v26 = vld [vmem:[%s3803_s6 + $0xa0] sm:$0x3]  ;;  %2493 = vst [vmem:[%s3808_s5 + $0x70] sm:$0x3] %v2492_v24 }
  0x2f   : > { %2495 = vst [vmem:[%s3808_s5 + $0x88] sm:$0x3] %v2494_v25  ;;  %2497 = vst [vmem:[%s3808_s5 + $0xa0] sm:$0x3] %v2496_v26  ;;  %v2498_v27 = vld [vmem:[%s3803_s6 + $0xb8] sm:$0x3] }
  0x30   : > { %v2500_v28 = vld [vmem:[%s3803_s6 + $0xd0] sm:$0x3]  ;;  %v2502_v29 = vld [vmem:[%s3803_s6 + $0xe8] sm:$0x3]  ;;  %2499 = vst [vmem:[%s3808_s5 + $0xb8] sm:$0x3] %v2498_v27 }
  0x31   : > { %2501 = vst [vmem:[%s3808_s5 + $0xd0] sm:$0x3] %v2500_v28  ;;  %2503 = vst [vmem:[%s3808_s5 + $0xe8] sm:$0x3] %v2502_v29 }
  0x32   : > { %333 = vsyncadd %s203_s7, 2880 }
  0x33 PF: > { %s334_s8 = sadd.s32 1, %s3674_s15 }
  0x34   : > { %p335_p1 = scmp.lt.s32.totalorder %s334_s8, 2 }
  0x35   : > { %s340_s9 = ssub.s32 (%p335_p1), 1, %s5064_s10  ;;  %s2374_s20 = smul.u32 (%p335_p1), 192, %s3674_s15 }
  0x36   : > { %339 = sbr.rel (!%p335_p1) target bundleno = 77 (0x4d), region = 73  ;;  %s348_s7 = scalar_lea.sflag (%p335_p1), [#allocation3], %s340_s9 }
  0x37   : > { %s2375_s21 = smul.u32 (%p335_p1), 432, %s3678_s16 }
  0x38   : > { %s346_s24 = smul.u32 (%p335_p1), 240, %s340_s9 }
  0x39   : > { %s2376_s27 = sadd.s32 (%p335_p1), %s2375_s21, %s2374_s20 }
  0x3a   : > { %s3877_s6 = scalar_lea.vmem (%p335_p1), %s5004_s0, %s2376_s27  ;;  %s3882_s5 = scalar_lea.vmem (%p335_p1), [#allocation2], %s346_s24 }
  0x3b   : > { %v2506_v30 = vld [vmem:[%s3877_s6 + $0xc0] sm:$0xff]  ;;  %v2507_v31 = vld [vmem:[%s3877_s6 + $0xc8] sm:$0xff]  ;;  %v2508_v32 = vld [vmem:[%s3877_s6 + $0xd8] sm:$0xff] }
  0x3c   : > { %406 = vst [vmem:[%s3882_s5] sm:$0xff] %v2506_v30  ;;  %408 = vst [vmem:[%s3882_s5 + $0x8] sm:$0xff] %v2507_v31  ;;  %v2509_v33 = vld [vmem:[%s3877_s6 + $0xe0] sm:$0xff]  ;;  %v2510_v34 = vld [vmem:[%s3877_s6 + $0xf0] sm:$0xff] }
  0x3d   : > { %410 = vst [vmem:[%s3882_s5 + $0x18] sm:$0xff] %v2508_v32  ;;  %v2511_v35 = vld [vmem:[%s3877_s6 + $0xf8] sm:$0xff]  ;;  %412 = vst [vmem:[%s3882_s5 + $0x20] sm:$0xff] %v2509_v33  ;;  %v2512_v36 = vld [vmem:[%s3877_s6 + $0x108] sm:$0xff] }
  0x3e   : > { %414 = vst [vmem:[%s3882_s5 + $0x30] sm:$0xff] %v2510_v34  ;;  %416 = vst [vmem:[%s3882_s5 + $0x38] sm:$0xff] %v2511_v35  ;;  %v2513_v37 = vld [vmem:[%s3877_s6 + $0x110] sm:$0xff]  ;;  %v2514_v38 = vld [vmem:[%s3877_s6 + $0x120] sm:$0xff] }
  0x3f   : > { %418 = vst [vmem:[%s3882_s5 + $0x48] sm:$0xff] %v2512_v36  ;;  %420 = vst [vmem:[%s3882_s5 + $0x50] sm:$0xff] %v2513_v37  ;;  %v2515_v39 = vld [vmem:[%s3877_s6 + $0x128] sm:$0xff]  ;;  %v2516_v40 = vld [vmem:[%s3877_s6 + $0x138] sm:$0xff] }
  0x40   : > { %422 = vst [vmem:[%s3882_s5 + $0x60] sm:$0xff] %v2514_v38  ;;  %v2517_v41 = vld [vmem:[%s3877_s6 + $0x140] sm:$0xff]  ;;  %424 = vst [vmem:[%s3882_s5 + $0x68] sm:$0xff] %v2515_v39  ;;  %v2518_v42 = vld [vmem:[%s3877_s6 + $0x150] sm:$0xff] }
  0x41   : > { %426 = vst [vmem:[%s3882_s5 + $0x78] sm:$0xff] %v2516_v40  ;;  %428 = vst [vmem:[%s3882_s5 + $0x80] sm:$0xff] %v2517_v41  ;;  %v2519_v43 = vld [vmem:[%s3877_s6 + $0x158] sm:$0xff]  ;;  %v2520_v44 = vld [vmem:[%s3877_s6 + $0x168] sm:$0xff] }
  0x42   : > { %430 = vst [vmem:[%s3882_s5 + $0x90] sm:$0xff] %v2518_v42  ;;  %432 = vst [vmem:[%s3882_s5 + $0x98] sm:$0xff] %v2519_v43  ;;  %v2521_v45 = vld [vmem:[%s3877_s6 + $0x170] sm:$0xff]  ;;  %v2522_v46 = vld [vmem:[%s3877_s6 + $0x180] sm:$0xff] }
  0x43   : > { %434 = vst [vmem:[%s3882_s5 + $0xa8] sm:$0xff] %v2520_v44  ;;  %v2523_v47 = vld [vmem:[%s3877_s6 + $0x188] sm:$0xff]  ;;  %436 = vst [vmem:[%s3882_s5 + $0xb0] sm:$0xff] %v2521_v45  ;;  %v2524_v48 = vld [vmem:[%s3877_s6 + $0x198] sm:$0xff] }
  0x44   : > { %438 = vst [vmem:[%s3882_s5 + $0xc0] sm:$0xff] %v2522_v46  ;;  %440 = vst [vmem:[%s3882_s5 + $0xc8] sm:$0xff] %v2523_v47  ;;  %v2525_v49 = vld [vmem:[%s3877_s6 + $0x1a0] sm:$0xff]  ;;  %v2526_v50 = vld [vmem:[%s3877_s6 + $0xd0] sm:$0x3] }
  0x45   : > { %442 = vst [vmem:[%s3882_s5 + $0xd8] sm:$0xff] %v2524_v48  ;;  %444 = vst [vmem:[%s3882_s5 + $0xe0] sm:$0xff] %v2525_v49  ;;  %v2528_v51 = vld [vmem:[%s3877_s6 + $0xe8] sm:$0x3]  ;;  %v2530_v52 = vld [vmem:[%s3877_s6 + $0x100] sm:$0x3] }
  0x46   : > { %2527 = vst [vmem:[%s3882_s5 + $0x10] sm:$0x3] %v2526_v50  ;;  %v2532_v53 = vld [vmem:[%s3877_s6 + $0x118] sm:$0x3]  ;;  %2529 = vst [vmem:[%s3882_s5 + $0x28] sm:$0x3] %v2528_v51 }
  0x47   : > { %2531 = vst [vmem:[%s3882_s5 + $0x40] sm:$0x3] %v2530_v52  ;;  %2533 = vst [vmem:[%s3882_s5 + $0x58] sm:$0x3] %v2532_v53  ;;  %v2534_v54 = vld [vmem:[%s3877_s6 + $0x130] sm:$0x3] }
  0x48   : > { %v2536_v55 = vld [vmem:[%s3877_s6 + $0x148] sm:$0x3]  ;;  %v2538_v56 = vld [vmem:[%s3877_s6 + $0x160] sm:$0x3]  ;;  %2535 = vst [vmem:[%s3882_s5 + $0x70] sm:$0x3] %v2534_v54 }
  0x49   : > { %2537 = vst [vmem:[%s3882_s5 + $0x88] sm:$0x3] %v2536_v55  ;;  %2539 = vst [vmem:[%s3882_s5 + $0xa0] sm:$0x3] %v2538_v56  ;;  %v2540_v57 = vld [vmem:[%s3877_s6 + $0x178] sm:$0x3] }
  0x4a   : > { %v2542_v58 = vld [vmem:[%s3877_s6 + $0x190] sm:$0x3]  ;;  %v2544_v59 = vld [vmem:[%s3877_s6 + $0x1a8] sm:$0x3]  ;;  %2541 = vst [vmem:[%s3882_s5 + $0xb8] sm:$0x3] %v2540_v57 }
  0x4b   : > { %2543 = vst [vmem:[%s3882_s5 + $0xd0] sm:$0x3] %v2542_v58  ;;  %2545 = vst [vmem:[%s3882_s5 + $0xe8] sm:$0x3] %v2544_v59 }
  0x4c   : > { %478 = vsyncadd %s348_s7, 2880 }
  0x4d PF: > { %s482_s8 = scalar_lea.sflag [#allocation3], %s5064_s10 }
  0x4e   : > { %3654 = dma.done.wait %s482_s8, 2880 }
  0x4f   : > { %3655 = vsyncadd %s482_s8, 4294964416  ;;  %v2571_v60 = vld [vmem:[%s5005_s1 + $0x1f8] sm:$0xff]  ;;  %v2570_v62 = vld [vmem:[%s5005_s1 + $0x1f0] sm:$0xff]  ;;  %s487_s5 = smul.u32 240, %s5064_s10  ;;  %vm1655_vm0 = vcmask 1045504   ;;  %vm1044_vm1 = vcmask 1046528  }
  0x50   : > { %v534_v61 = vld [vmem:[%s5005_s1 + $0x78] sm:$0xff]  ;;  %2983 = vmatprep.subr.mxu0 %v2571_v60  ;;  %v533_v63 = vld [vmem:[%s5005_s1 + $0x70] sm:$0xff]  ;;  %v2569_v0 = vld [vmem:[%s5005_s1 + $0x1e8] sm:$0xff]  ;;  %s2686_s10 = sshll.u32 %s3674_s15, 4  ;;  %s2687_s28 = sshll.u32 %s3678_s16, 5 }
  0x51   : > { %3039 = vmatprep.subr.mxu1 %v534_v61  ;;  %2984 = vmatpush3.msra.mxu0 %v2571_v60  ;;  %v532_v1 = vld [vmem:[%s5005_s1 + $0x68] sm:$0xff]  ;;  %v2568_v2 = vld [vmem:[%s5005_s1 + $0x1e0] sm:$0xff]  ;;  %v2567_v4 = vld [vmem:[%s5005_s1 + $0x1d8] sm:$0xff]  ;;  %s4041_s8 = scalar_lea.vmem [#allocation2], %s487_s5  ;;  %s2313_s15 = sadd.s32 %s2687_s28, %s2686_s10 }
  0x52   : > { %3040 = vmatpush3.msra.mxu1 %v534_v61  ;;  %2985 = vmatprep.subr.mxu0 %v2570_v62  ;;  %v531_v3 = vld [vmem:[%s5005_s1 + $0x60] sm:$0xff]  ;;  %v530_v5 = vld [vmem:[%s5005_s1 + $0x58] sm:$0xff]  ;;  %v2566_v6 = vld [vmem:[%s5005_s1 + $0x1d0] sm:$0xff]  ;;  %s2688_s16 = sshll.u32 %s2313_s15, 7  ;;  %s2316_s29 = sshll.u32 %s3795_s11, 4  ;;  %s4943_s29 = int_to_ptr.vmem [resolvable:$true] %s2316_s29 }
  0x53   : > { %3041 = vmatprep.subr.mxu1 %v533_v63  ;;  %2986 = vmatpush3.msra.mxu0 %v2570_v62  ;;  %v529_v7 = vld [vmem:[%s5005_s1 + $0x50] sm:$0xff]  ;;  %v2565_v8 = vld [vmem:[%s5005_s1 + $0x1c8] sm:$0xff]  ;;  %v2564_v10 = vld [vmem:[%s5005_s1 + $0x1c0] sm:$0xff]  ;;  %s4941_s7 = scalar_lea.hbm %s5007_s3, %s2688_s16  ;;  %s4953_s5 = scalar_lea.sflag [#allocation5], %s167_s4 }
  0x54   : > { %3042 = vmatpush3.msra.mxu1 %v533_v63  ;;  %2987 = vmatprep.subr.mxu0 %v2569_v0  ;;  %v528_v9 = vld [vmem:[%s5005_s1 + $0x48] sm:$0xff]  ;;  %v527_v11 = vld [vmem:[%s5005_s1 + $0x40] sm:$0xff]  ;;  %v2563_v12 = vld [vmem:[%s5005_s1 + $0x1b8] sm:$0xff]  ;;  %s3596_s20 = scalar_lea.vmem %s4943_s29, 2048  ;;  %s3692_s21 = smov [#allocation4]  }
  0x55   : > { %3043 = vmatprep.subr.mxu1 %v532_v1  ;;  %2988 = vmatpush3.msra.mxu0 %v2569_v0  ;;  %v526_v13 = vld [vmem:[%s5005_s1 + $0x38] sm:$0xff]  ;;  %v2562_v14 = vld [vmem:[%s5005_s1 + $0x1b0] sm:$0xff]  ;;  %v2561_v16 = vld [vmem:[%s5005_s1 + $0x1a8] sm:$0xff]  ;;  %p3597_p2 = scmp.ne.s32.totalorder %s4943_s29, %s3596_s20  ;;  %s3600_s24 = sshll.u32 %s3692_s21, 4  ;;  %s3601_s24 = int_to_ptr.vmem [resolvable:$false] %s3600_s24 }
  0x56   : > { %3044 = vmatpush3.msra.mxu1 %v532_v1  ;;  %2989 = vmatprep.subr.mxu0 %v2568_v2  ;;  %v525_v15 = vld [vmem:[%s5005_s1 + $0x30] sm:$0xff]  ;;  %v524_v17 = vld [vmem:[%s5005_s1 + $0x28] sm:$0xff]  ;;  %v2560_v18 = vld [vmem:[%s5005_s1 + $0x1a0] sm:$0xff]  ;;  %p3603_p6 = scmp.lt.s32.totalorder %s4943_s29, %s3601_s24 }
  0x57   : > { %3045 = vmatprep.subr.mxu1 %v531_v3  ;;  %2990 = vmatpush3.msra.mxu0 %v2568_v2  ;;  %v523_v19 = vld [vmem:[%s5005_s1 + $0x20] sm:$0xff]  ;;  %v2559_v20 = vld [vmem:[%s5005_s1 + $0x198] sm:$0xff]  ;;  %v2558_v22 = vld [vmem:[%s5005_s1 + $0x190] sm:$0xff]  ;;  %p3598_p4 = pnand %p3597_p2, %p3766_p3 }
  0x58   : > { %3046 = vmatpush3.msra.mxu1 %v531_v3  ;;  %2991 = vmatprep.subr.mxu0 %v2567_v4  ;;  %v522_v21 = vld [vmem:[%s5005_s1 + $0x18] sm:$0xff]  ;;  %v521_v23 = vld [vmem:[%s5005_s1 + $0x10] sm:$0xff]  ;;  %v2557_v24 = vld [vmem:[%s5005_s1 + $0x188] sm:$0xff] }
  0x59   : > { %3047 = vmatprep.subr.mxu1 %v530_v5  ;;  %2992 = vmatpush3.msra.mxu0 %v2567_v4  ;;  %v520_v25 = vld [vmem:[%s5005_s1 + $0x8] sm:$0xff]  ;;  %v2556_v26 = vld [vmem:[%s5005_s1 + $0x180] sm:$0xff]  ;;  %v2587_v32 = vld [vmem:[%s5005_s1 + $0x378] sm:$0xff]  ;;  %p3599_p5 = pneg %p3598_p4 }
  0x5a   : > { %3048 = vmatpush3.msra.mxu1 %v530_v5  ;;  %2993 = vmatprep.subr.mxu0 %v2566_v6  ;;  %v519_v27 = vld [vmem:[%s5005_s1] sm:$0xff]  ;;  %v4044_v28 = vld [vmem:[%s4041_s8 + $0x18] sm:$0xff]  ;;  %v4053_v31 = vld [vmem:[%s4041_s8 + $0x8] sm:$0xff] }
  0x5b   : > { %3049 = vmatprep.subr.mxu1 %v529_v7  ;;  %2994 = vmatpush3.msra.mxu0 %v2566_v6  ;;  %v4047_v29 = vld [vmem:[%s4041_s8] sm:$0xff]  ;;  %v2603_v33 = vld [vmem:[%s5005_s1 + $0xf8] sm:$0xff]  ;;  %v4072_v36 = vld [vmem:[%s4041_s8 + $0x30] sm:$0xff]  ;;  %v1657_v44 = vrot.slane %v4053_v31, 2  ;;  %v1661_v53 = vrot.slane %v4044_v28, 2 }
  0x5c   : > { %3050 = vmatpush3.msra.mxu1 %v529_v7  ;;  %2995 = vmatprep.subr.mxu0 %v2565_v8  ;;  %v4050_v30 = vld [vmem:[%s4041_s8 + $0x20] sm:$0xff]  ;;  %v4075_v37 = vld [vmem:[%s4041_s8 + $0x38] sm:$0xff]  ;;  %v4094_v42 = vld [vmem:[%s4041_s8 + $0x48] sm:$0xff]  ;;  %v1656_v43 = vrot.slane %v4047_v29, 2 }
  0x5d   : > { %3051 = vmatprep.subr.mxu1 %v528_v9  ;;  %2996 = vmatpush3.msra.mxu0 %v2565_v8  ;;  %v2586_v34 = vld [vmem:[%s5005_s1 + $0x370] sm:$0xff]  ;;  %v2585_v38 = vld [vmem:[%s5005_s1 + $0x368] sm:$0xff]  ;;  %v2584_v40 = vld [vmem:[%s5005_s1 + $0x360] sm:$0xff]  ;;  %v1662_v54 = vrot.slane %v4050_v30, 2 }
  0x5e   : > { %3052 = vmatpush3.msra.mxu1 %v528_v9  ;;  %2997 = vmatprep.subr.mxu0 %v2564_v10  ;;  %v2602_v35 = vld [vmem:[%s5005_s1 + $0xf0] sm:$0xff]  ;;  %v2601_v39 = vld [vmem:[%s5005_s1 + $0xe8] sm:$0xff]  ;;  %v2600_v41 = vld [vmem:[%s5005_s1 + $0xe0] sm:$0xff]  ;;  %v4130_v56 = vsel %vm1655_vm0, %v1656_v43, %v1657_v44 }
  0x5f   : > { %3053 = vmatprep.subr.mxu1 %v527_v11  ;;  %2998 = vmatpush3.msra.mxu0 %v2564_v10  ;;  %v4099_v45 = vld [vmem:[%s4041_s8 + $0x50] sm:$0xff]  ;;  %v2583_v46 = vld [vmem:[%s5005_s1 + $0x358] sm:$0xff]  ;;  %v4127_v55 = vld [vmem:[%s4041_s8 + $0x60] sm:$0xff]  ;;  %v4137_v59 = vsel %vm1655_vm0, %v1661_v53, %v1662_v54 }
  0x60   : > { %3054 = vmatpush3.msra.mxu1 %v527_v11  ;;  %2999 = vmatprep.subr.mxu0 %v2563_v12  ;;  %v2599_v47 = vld [vmem:[%s5005_s1 + $0xd8] sm:$0xff]  ;;  %v2582_v49 = vld [vmem:[%s5005_s1 + $0x350] sm:$0xff]  ;;  %v2581_v1 = vld [vmem:[%s5005_s1 + $0x348] sm:$0xff] }
  0x61   : > { %3055 = vmatprep.subr.mxu1 %v526_v13  ;;  %3000 = vmatpush3.msra.mxu0 %v2563_v12  ;;  %v4110_v48 = vld [vmem:[%s4041_s8 + $0x28] sm:$0x3]  ;;  %v2598_v51 = vld [vmem:[%s5005_s1 + $0xd0] sm:$0xff]  ;;  %v2580_v7 = vld [vmem:[%s5005_s1 + $0x340] sm:$0xff] }
  0x62   : > { %3056 = vmatpush3.msra.mxu1 %v526_v13  ;;  %3001 = vmatprep.subr.mxu0 %v2562_v14  ;;  %v1664_v50 = vrot.slane %v4110_v48, 2  ;;  %v4122_v52 = vld [vmem:[%s4041_s8 + $0x10] sm:$0x3]  ;;  %v4134_v58 = vld [vmem:[%s4041_s8 + $0xc8] sm:$0xff]  ;;  %v4143_v61 = vld [vmem:[%s4041_s8 + $0xe0] sm:$0xff] }
  0x63   : > { %3057 = vmatprep.subr.mxu1 %v525_v15  ;;  %3002 = vmatpush3.msra.mxu0 %v2562_v14  ;;  %v1659_v57 = vrot.slane %v4122_v52, 2  ;;  %v4140_v60 = vld [vmem:[%s4041_s8 + $0x68] sm:$0xff]  ;;  %v1283_v62 = vrot.slane %v4134_v58, 1  ;;  %v1471_v3 = vrot.slane %v4143_v61, 1  ;;  %v515_v4 = vld [vmem:[%s4041_s8 + $0xd0] sm:$0x3] }
  0x64   : > { %3058 = vmatpush3.msra.mxu1 %v525_v15  ;;  %3003 = vmatprep.subr.mxu0 %v2561_v16  ;;  %v4150_v0 = vsel %vm1655_vm0, %v1662_v54, %v1664_v50  ;;  %v2597_v2 = vld [vmem:[%s5005_s1 + $0xc8] sm:$0xff]  ;;  %v1285_v5 = vrot.slane %v515_v4, 1  ;;  %v2596_v8 = vld [vmem:[%s5005_s1 + $0xc0] sm:$0xff]  ;;  %v2579_v14 = vld [vmem:[%s5005_s1 + $0x338] sm:$0xff]  ;;  %v1055_v54 = vrot.slane %v4072_v36, 1 }
  0x65   : > { %3059 = vmatprep.subr.mxu1 %v524_v17  ;;  %3004 = vmatpush3.msra.mxu0 %v2561_v16  ;;  %v4147_v63 = vsel %vm1655_vm0, %v1657_v44, %v1659_v57  ;;  %v518_v6 = vld [vmem:[%s4041_s8 + $0xe8] sm:$0x3]  ;;  %v4172_v10 = vld [vmem:[%s4041_s8 + $0x78] sm:$0xff]  ;;  %v4185_v13 = vld [vmem:[%s4041_s8 + $0x80] sm:$0xff]  ;;  %v1056_v57 = vrot.slane %v4075_v37, 1 }
  0x66   : > { %3060 = vmatpush3.msra.mxu1 %v524_v17  ;;  %3005 = vmatprep.subr.mxu0 %v2560_v18  ;;  %v1473_v9 = vrot.slane %v518_v6, 1  ;;  %v4177_v11 = vsel %vm1044_vm1, %v1283_v62, %v1285_v5  ;;  %v2595_v15 = vld [vmem:[%s5005_s1 + $0xb8] sm:$0xff]  ;;  %v2578_v16 = vld [vmem:[%s5005_s1 + $0x330] sm:$0xff]  ;;  %v2616_v5 = vld [vmem:[%s5005_s1 + $0x260] sm:$0xff] }
  0x67   : > { %3061 = vmatprep.subr.mxu1 %v523_v19  ;;  %3006 = vmatpush3.msra.mxu0 %v2560_v18  ;;  %v2594_v17 = vld [vmem:[%s5005_s1 + $0xb0] sm:$0xff]  ;;  %v2635_v50 = vld [vmem:[%s5005_s1 + $0x3f8] sm:$0xff]  ;;  %v2632_v6 = vld [vmem:[%s5005_s1 + $0x3e0] sm:$0xff] }
  0x68   : > { %3062 = vmatpush3.msra.mxu1 %v523_v19  ;;  %3007 = vmatprep.subr.mxu0 %v2559_v20  ;;  %v4182_v12 = vsel %vm1044_vm1, %v1471_v3, %v1473_v9  ;;  %v4204_v18 = vld [vmem:[%s4041_s8 + $0x90] sm:$0xff]  ;;  %v4207_v19 = vld [vmem:[%s4041_s8 + $0x98] sm:$0xff]  ;;  %v4292_v53 = vld [vmem:[%s4041_s8 + $0x40] sm:$0x3] }
  0x69   : > { %3063 = vmatprep.subr.mxu1 %v522_v21  ;;  %3008 = vmatpush3.msra.mxu0 %v2559_v20  ;;  %v2577_v20 = vld [vmem:[%s5005_s1 + $0x328] sm:$0xff]  ;;  %v1058_v4 = vrot.slane %v4292_v53, 1 }
  0x6a   : > { %3064 = vmatpush3.msra.mxu1 %v522_v21  ;;  %3009 = vmatprep.subr.mxu0 %v2558_v22  ;;  %v2593_v21 = vld [vmem:[%s5005_s1 + $0xa8] sm:$0xff] }
  0x6b   : > { %3065 = vmatprep.subr.mxu1 %v521_v23  ;;  %3010 = vmatpush3.msra.mxu0 %v2558_v22  ;;  %v2576_v22 = vld [vmem:[%s5005_s1 + $0x320] sm:$0xff]  ;;  %v4323_v9 = vsel %vm1044_vm1, %v1056_v57, %v1058_v4  ;;  %v2609_v4 = vld [vmem:[%s5005_s1 + $0x228] sm:$0xff] }
  0x6c   : > { %3066 = vmatpush3.msra.mxu1 %v521_v23  ;;  %3011 = vmatprep.subr.mxu0 %v2557_v24  ;;  %v2592_v23 = vld [vmem:[%s5005_s1 + $0xa0] sm:$0xff] }
  0x6d   : > { %3067 = vmatprep.subr.mxu1 %v520_v25  ;;  %3012 = vmatpush3.msra.mxu0 %v2557_v24  ;;  %v4226_v24 = vld [vmem:[%s4041_s8 + $0xa8] sm:$0xff] }
  0x6e   : > { %3068 = vmatpush3.msra.mxu1 %v520_v25  ;;  %3013 = vmatprep.subr.mxu0 %v2556_v26  ;;  %v4229_v25 = vld [vmem:[%s4041_s8 + $0xb0] sm:$0xff] }
  0x6f   : > { %3069 = vmatprep.subr.mxu1 %v519_v27  ;;  %3014 = vmatpush3.msra.mxu0 %v2556_v26  ;;  %v2575_v26 = vld [vmem:[%s5005_s1 + $0x318] sm:$0xff] }
  0x70   : > { %3015 = vmatprep.mubr.f32.mxu0 %v4044_v28  ;;  %3070 = vmatpush3.msra.mxu1 %v519_v27  ;;  %v2591_v27 = vld [vmem:[%s5005_s1 + $0x98] sm:$0xff] }
  0x71   : > { %3071 = vmatprep.mubr.f32.mxu1 %v4047_v29  ;;  %3016 = vmatmul.mubr.f32.vlgmr.msra.gmra.mxu0 %v4050_v30 }
  0x72   : > { %3072 = vmatmul.mubr.f32.vlgmr.msra.gmra.mxu1 %v4053_v31  ;;  %3095 = vmatprep.subr.mxu0 %v2587_v32 }
  0x73   : > { %3151 = vmatprep.subr.mxu1 %v2603_v33  ;;  %3096 = vmatpush3.msra.mxu0 %v2587_v32  ;;  %v2574_v32 = vld [vmem:[%s5005_s1 + $0x310] sm:$0xff] }
  0x74   : > { %3152 = vmatpush3.msra.mxu1 %v2603_v33  ;;  %3097 = vmatprep.subr.mxu0 %v2586_v34  ;;  %v2590_v33 = vld [vmem:[%s5005_s1 + $0x90] sm:$0xff] }
  0x75   : > { %3153 = vmatprep.subr.mxu1 %v2602_v35  ;;  %3018 = vmatprep.mubr.f32.mxu0 %v4072_v36 }
  0x76   : > { %3074 = vmatprep.mubr.f32.mxu1 %v4044_v28  ;;  %3098 = vmatpush3.msra.mxu0 %v2586_v34  ;;  %v4248_v34 = vld [vmem:[%s4041_s8 + $0xc0] sm:$0xff] }
  0x77   : > { %3154 = vmatpush3.msra.mxu1 %v2602_v35  ;;  %3019 = vmatmul.mubr.f32.gmra.mxu0 %v4075_v37  ;;  %v1045_v35 = vrot.slane %v4047_v29, 1  ;;  %v2572_v29 = vld [vmem:[%s5005_s1 + $0x300] sm:$0xff] }
  0x78   : > { %3075 = vmatmul.mubr.f32.gmra.mxu1 %v4050_v30  ;;  %3099 = vmatprep.subr.mxu0 %v2585_v38 }
  0x79   : > { %3155 = vmatprep.subr.mxu1 %v2601_v39  ;;  %3100 = vmatpush3.msra.mxu0 %v2585_v38  ;;  %v1046_v38 = vrot.slane %v4053_v31, 1  ;;  %v2588_v31 = vld [vmem:[%s5005_s1 + $0x80] sm:$0xff] }
  0x7a   : > { %3156 = vmatpush3.msra.mxu1 %v2601_v39  ;;  %3101 = vmatprep.subr.mxu0 %v2584_v40  ;;  %v2573_v39 = vld [vmem:[%s5005_s1 + $0x308] sm:$0xff] }
  0x7b   : > { %3157 = vmatprep.subr.mxu1 %v2600_v41  ;;  %3021 = vmatprep.mubr.f32.mxu0 %v4094_v42  ;;  %v1047_v43 = vsel %vm1044_vm1, %v1045_v35, %v1046_v38  ;;  %v2613_v35 = vld [vmem:[%s5005_s1 + $0x248] sm:$0xff] }
  0x7c   : > { %3077 = vmatprep.mubr.f32.mxu1 %v4072_v36  ;;  %3102 = vmatpush3.msra.mxu0 %v2584_v40  ;;  %v2589_v40 = vld [vmem:[%s5005_s1 + $0x88] sm:$0xff] }
  0x7d   : > { %3158 = vmatpush3.msra.mxu1 %v2600_v41  ;;  %3022 = vmatmul.mubr.f32.gmra.mxu0 %v4099_v45  ;;  %v1048_v41 = vrot.slane %v4122_v52, 1 }
  0x7e   : > { %3078 = vmatmul.mubr.f32.gmra.mxu1 %v4075_v37  ;;  %3103 = vmatprep.subr.mxu0 %v2583_v46 }
  0x7f   : > { %3159 = vmatprep.subr.mxu1 %v2599_v47  ;;  %3104 = vmatpush3.msra.mxu0 %v2583_v46  ;;  %v1049_v44 = vsel %vm1044_vm1, %v1046_v38, %v1048_v41  ;;  %v1050_v46 = vrot.slane %v4044_v28, 1  ;;  %v2618_v28 = vld [vmem:[%s5005_s1 + $0x270] sm:$0xff]  ;;  %v2629_v38 = vld [vmem:[%s5005_s1 + $0x3c8] sm:$0xff]  ;;  %v2628_v41 = vld [vmem:[%s5005_s1 + $0x3c0] sm:$0xff] }
  0x80   : > { %3160 = vmatpush3.msra.mxu1 %v2599_v47  ;;  %3105 = vmatprep.subr.mxu0 %v2582_v49  ;;  %v1051_v47 = vrot.slane %v4050_v30, 1  ;;  %v2634_v30 = vld [vmem:[%s5005_s1 + $0x3f0] sm:$0xff] }
  0x81   : > { %3161 = vmatprep.subr.mxu1 %v2598_v51  ;;  %3024 = vmatprep.mubr.f32.mxu0 %v4127_v55 }
  0x82   : > { %3080 = vmatprep.mubr.f32.mxu1 %v4094_v42  ;;  %3106 = vmatpush3.msra.mxu0 %v2582_v49  ;;  %v2619_v49 = vld [vmem:[%s5005_s1 + $0x278] sm:$0xff]  ;;  %v4289_v52 = vsel %vm1044_vm1, %v1050_v46, %v1051_v47  ;;  %v1071_v46 = vrot.slane %v4185_v13, 1 }
  0x83   : > { %3162 = vmatpush3.msra.mxu1 %v2598_v51  ;;  %3025 = vmatmul.mubr.f32.gmra.mxu0 %v4140_v60  ;;  %v1053_v51 = vrot.slane %v4110_v48, 1 }
  0x84   : > { %3081 = vmatmul.mubr.f32.gmra.mxu1 %v4099_v45  ;;  %3107 = vmatprep.subr.mxu0 %v2581_v1 }
  0x85   : > { %3163 = vmatprep.subr.mxu1 %v2597_v2  ;;  %3108 = vmatpush3.msra.mxu0 %v2581_v1  ;;  %v4295_v48 = vsel %vm1044_vm1, %v1051_v47, %v1053_v51  ;;  %v2617_v1 = vld [vmem:[%s5005_s1 + $0x268] sm:$0xff]  ;;  %v2611_v47 = vld [vmem:[%s5005_s1 + $0x238] sm:$0xff]  ;;  %v2610_v51 = vld [vmem:[%s5005_s1 + $0x230] sm:$0xff] }
  0x86   : > { %3164 = vmatpush3.msra.mxu1 %v2597_v2  ;;  %3109 = vmatprep.subr.mxu0 %v2580_v7  ;;  %v2633_v2 = vld [vmem:[%s5005_s1 + $0x3e8] sm:$0xff] }
  0x87   : > { %3165 = vmatprep.subr.mxu1 %v2596_v8  ;;  %3027 = vmatprep.mubr.f32.mxu0 %v4172_v10 }
  0x88   : > { %3083 = vmatprep.mubr.f32.mxu1 %v4127_v55  ;;  %3110 = vmatpush3.msra.mxu0 %v2580_v7  ;;  %v4317_v7 = vsel %vm1044_vm1, %v1055_v54, %v1056_v57  ;;  %v4404_v54 = vld [vmem:[%s4041_s8 + $0xa0] sm:$0x3] }
  0x89   : > { %3166 = vmatpush3.msra.mxu1 %v2596_v8  ;;  %3028 = vmatmul.mubr.f32.gmra.mxu0 %v4185_v13  ;;  %v4320_v8 = vld [vmem:[%s4041_s8 + $0x58] sm:$0x3] }
  0x8a   : > { %3084 = vmatmul.mubr.f32.gmra.mxu1 %v4140_v60  ;;  %3111 = vmatprep.subr.mxu0 %v2579_v14 }
  0x8b   : > { %3167 = vmatprep.subr.mxu1 %v2595_v15  ;;  %3112 = vmatpush3.msra.mxu0 %v2579_v14  ;;  %v1060_v14 = vrot.slane %v4094_v42, 1 }
  0x8c   : > { %3168 = vmatpush3.msra.mxu1 %v2595_v15  ;;  %3113 = vmatprep.subr.mxu0 %v2578_v16  ;;  %v1061_v15 = vrot.slane %v4099_v45, 1 }
  0x8d   : > { %3169 = vmatprep.subr.mxu1 %v2594_v17  ;;  %3030 = vmatprep.mubr.f32.mxu0 %v4204_v18 }
  0x8e   : > { %3086 = vmatprep.mubr.f32.mxu1 %v4172_v10  ;;  %3114 = vmatpush3.msra.mxu0 %v2578_v16  ;;  %v2615_v16 = vld [vmem:[%s5005_s1 + $0x258] sm:$0xff] }
  0x8f   : > { %3170 = vmatpush3.msra.mxu1 %v2594_v17  ;;  %3031 = vmatmul.mubr.f32.gmra.mxu0 %v4207_v19  ;;  %v2631_v17 = vld [vmem:[%s5005_s1 + $0x3d8] sm:$0xff] }
  0x90   : > { %3087 = vmatmul.mubr.f32.gmra.mxu1 %v4185_v13  ;;  %3115 = vmatprep.subr.mxu0 %v2577_v20 }
  0x91   : > { %3171 = vmatprep.subr.mxu1 %v2593_v21  ;;  %3116 = vmatpush3.msra.mxu0 %v2577_v20  ;;  %v1063_v20 = vrot.slane %v4320_v8, 1 }
  0x92   : > { %3172 = vmatpush3.msra.mxu1 %v2593_v21  ;;  %3117 = vmatprep.subr.mxu0 %v2576_v22  ;;  %v2614_v21 = vld [vmem:[%s5005_s1 + $0x250] sm:$0xff] }
  0x93   : > { %3173 = vmatprep.subr.mxu1 %v2592_v23  ;;  %3033 = vmatprep.mubr.f32.mxu0 %v4226_v24 }
  0x94   : > { %3089 = vmatprep.mubr.f32.mxu1 %v4204_v18  ;;  %3118 = vmatpush3.msra.mxu0 %v2576_v22  ;;  %v2630_v22 = vld [vmem:[%s5005_s1 + $0x3d0] sm:$0xff] }
  0x95   : > { %3174 = vmatpush3.msra.mxu1 %v2592_v23  ;;  %3034 = vmatmul.mubr.f32.gmra.mxu0 %v4229_v25  ;;  %v4345_v23 = vsel %vm1044_vm1, %v1060_v14, %v1061_v15  ;;  %v2608_v14 = vld [vmem:[%s5005_s1 + $0x220] sm:$0xff] }
  0x96   : > { %3090 = vmatmul.mubr.f32.gmra.mxu1 %v4207_v19  ;;  %3119 = vmatprep.subr.mxu0 %v2575_v26 }
  0x97   : > { %3175 = vmatprep.subr.mxu1 %v2591_v27  ;;  %3120 = vmatpush3.msra.mxu0 %v2575_v26  ;;  %v4348_v26 = vld [vmem:[%s4041_s8 + $0x70] sm:$0x3] }
  0x98   : > { %3176 = vmatpush3.msra.mxu1 %v2591_v27  ;;  %3121 = vmatprep.subr.mxu0 %v2574_v32  ;;  %v4351_v27 = vsel %vm1044_vm1, %v1061_v15, %v1063_v20  ;;  %v2624_v15 = vld [vmem:[%s5005_s1 + $0x3a0] sm:$0xff] }
  0x99   : > { %3177 = vmatprep.subr.mxu1 %v2590_v33  ;;  %3036 = vmatprep.mubr.f32.mxu0 %v4248_v34 }
  0x9a   : > { %3092 = vmatprep.mubr.f32.mxu1 %v4226_v24  ;;  %3122 = vmatpush3.msra.mxu0 %v2574_v32  ;;  %v1065_v32 = vrot.slane %v4127_v55, 1 }
  0x9b   : > { %3178 = vmatpush3.msra.mxu1 %v2590_v33  ;;  %3037 = vmatmul.mubr.f32.gmra.mxu0 %v4134_v58  ;;  %v1066_v33 = vrot.slane %v4140_v60, 1 }
  0x9c   : > { %3093 = vmatmul.mubr.f32.gmra.mxu1 %v4229_v25  ;;  %3123 = vmatprep.subr.mxu0 %v2573_v39 }
  0x9d   : > { %3179 = vmatprep.subr.mxu1 %v2589_v40  ;;  %3124 = vmatpush3.msra.mxu0 %v2573_v39  ;;  %v1068_v39 = vrot.slane %v4348_v26, 1 }
  0x9e   : > { %3180 = vmatpush3.msra.mxu1 %v2589_v40  ;;  %3125 = vmatprep.subr.mxu0 %v2572_v29  ;;  %v2612_v40 = vld [vmem:[%s5005_s1 + $0x240] sm:$0xff] }
  0x9f   : > { %3181 = vmatprep.subr.mxu1 %v2588_v31  ;;  %3126 = vmatpush3.msra.mxu0 %v2572_v29  ;;  %v4373_v29 = vsel %vm1044_vm1, %v1065_v32, %v1066_v33  ;;  %v2607_v32 = vld [vmem:[%s5005_s1 + $0x218] sm:$0xff] }
  0xa0   : > { %3127 = vmatprep.mubr.f32.mxu0 %v4072_v36  ;;  %3182 = vmatpush3.msra.mxu1 %v2588_v31  ;;  %v4376_v31 = vld [vmem:[%s4041_s8 + $0x88] sm:$0x3] }
  0xa1   : > { %3183 = vmatprep.mubr.f32.mxu1 %v1047_v43  ;;  %3128 = vmatmul.mubr.f32.vlgmr.msra.gmra.mxu0 %v4075_v37  ;;  %v4379_v43 = vsel %vm1044_vm1, %v1066_v33, %v1068_v39  ;;  %v2623_v33 = vld [vmem:[%s5005_s1 + $0x398] sm:$0xff]  ;;  %v2622_v39 = vld [vmem:[%s5005_s1 + $0x390] sm:$0xff] }
  0xa2   : > { %3184 = vmatmul.mubr.f32.vlgmr.msra.gmra.mxu1 %v1049_v44  ;;  %3207 = vmatprep.subr.mxu0 %v2619_v49  ;;  %v1070_v44 = vrot.slane %v4172_v10, 1 }
  0xa3   : > { %3263 = vmatprep.subr.mxu1 %v2635_v50  ;;  %3208 = vmatpush3.msra.mxu0 %v2619_v49  ;;  %v2627_v49 = vld [vmem:[%s5005_s1 + $0x3b8] sm:$0xff] }
  0xa4   : > { %3264 = vmatpush3.msra.mxu1 %v2635_v50  ;;  %3209 = vmatprep.subr.mxu0 %v2618_v28  ;;  %v1073_v50 = vrot.slane %v4376_v31, 1 }
  0xa5   : > { %3265 = vmatprep.subr.mxu1 %v2634_v30  ;;  %3130 = vmatprep.mubr.f32.mxu0 %v4094_v42 }
  0xa6   : > { %3186 = vmatprep.mubr.f32.mxu1 %v4289_v52  ;;  %3210 = vmatpush3.msra.mxu0 %v2618_v28  ;;  %v2626_v28 = vld [vmem:[%s5005_s1 + $0x3b0] sm:$0xff]  ;;  %v4407_v57 = vsel %vm1044_vm1, %v1071_v46, %v1073_v50  ;;  %v2620_v50 = vld [vmem:[%s5005_s1 + $0x380] sm:$0xff] }
  0xa7   : > { %3266 = vmatpush3.msra.mxu1 %v2634_v30  ;;  %3131 = vmatmul.mubr.f32.gmra.mxu0 %v4099_v45  ;;  %v4401_v30 = vsel %vm1044_vm1, %v1070_v44, %v1071_v46  ;;  %v2605_v46 = vld [vmem:[%s5005_s1 + $0x208] sm:$0xff] }
  0xa8   : > { %3187 = vmatmul.mubr.f32.gmra.mxu1 %v4295_v48  ;;  %3211 = vmatprep.subr.mxu0 %v2617_v1 }
  0xa9   : > { %3267 = vmatprep.subr.mxu1 %v2633_v2  ;;  %3212 = vmatpush3.msra.mxu0 %v2617_v1  ;;  %v1075_v1 = vrot.slane %v4204_v18, 1 }
  0xaa   : > { %3268 = vmatpush3.msra.mxu1 %v2633_v2  ;;  %3213 = vmatprep.subr.mxu0 %v2616_v5  ;;  %v1076_v2 = vrot.slane %v4207_v19, 1 }
  0xab   : > { %3269 = vmatprep.subr.mxu1 %v2632_v6  ;;  %3133 = vmatprep.mubr.f32.mxu0 %v4127_v55 }
  0xac   : > { %3189 = vmatprep.mubr.f32.mxu1 %v4317_v7  ;;  %3214 = vmatpush3.msra.mxu0 %v2616_v5  ;;  %v2625_v5 = vld [vmem:[%s5005_s1 + $0x3a8] sm:$0xff] }
  0xad   : > { %3270 = vmatpush3.msra.mxu1 %v2632_v6  ;;  %3134 = vmatmul.mubr.f32.gmra.mxu0 %v4140_v60  ;;  %v1078_v6 = vrot.slane %v4404_v54, 1 }
  0xae   : > { %3190 = vmatmul.mubr.f32.gmra.mxu1 %v4323_v9  ;;  %3215 = vmatprep.subr.mxu0 %v2615_v16 }
  0xaf   : > { %3271 = vmatprep.subr.mxu1 %v2631_v17  ;;  %3216 = vmatpush3.msra.mxu0 %v2615_v16  ;;  %v4429_v16 = vsel %vm1044_vm1, %v1075_v1, %v1076_v2  ;;  %v4435_v20 = vsel %vm1044_vm1, %v1076_v2, %v1078_v6  ;;  %v2650_v1 = vld [vmem:[%s5005_s1 + $0x170] sm:$0xff]  ;;  %v2665_v2 = vld [vmem:[%s5005_s1 + $0x2e8] sm:$0xff] }
  0xb0   : > { %3272 = vmatpush3.msra.mxu1 %v2631_v17  ;;  %3217 = vmatprep.subr.mxu0 %v2614_v21  ;;  %v4432_v17 = vld [vmem:[%s4041_s8 + $0xb8] sm:$0x3]  ;;  %v2662_v6 = vld [vmem:[%s5005_s1 + $0x2d0] sm:$0xff] }
  0xb1   : > { %3273 = vmatprep.subr.mxu1 %v2630_v22  ;;  %3136 = vmatprep.mubr.f32.mxu0 %v4172_v10 }
  0xb2   : > { %3192 = vmatprep.mubr.f32.mxu1 %v4345_v23  ;;  %3218 = vmatpush3.msra.mxu0 %v2614_v21  ;;  %v1080_v21 = vrot.slane %v4226_v24, 1 }
  0xb3   : > { %3274 = vmatpush3.msra.mxu1 %v2630_v22  ;;  %3137 = vmatmul.mubr.f32.gmra.mxu0 %v4185_v13  ;;  %v1081_v22 = vrot.slane %v4229_v25, 1 }
  0xb4   : > { %3193 = vmatmul.mubr.f32.gmra.mxu1 %v4351_v27  ;;  %3219 = vmatprep.subr.mxu0 %v2613_v35 }
  0xb5   : > { %3275 = vmatprep.subr.mxu1 %v2629_v38  ;;  %3220 = vmatpush3.msra.mxu0 %v2613_v35  ;;  %v1083_v35 = vrot.slane %v4432_v17, 1 }
  0xb6   : > { %3276 = vmatpush3.msra.mxu1 %v2629_v38  ;;  %3221 = vmatprep.subr.mxu0 %v2612_v40  ;;  %v2606_v38 = vld [vmem:[%s5005_s1 + $0x210] sm:$0xff] }
  0xb7   : > { %3277 = vmatprep.subr.mxu1 %v2628_v41  ;;  %3139 = vmatprep.mubr.f32.mxu0 %v4204_v18  ;;  %v4463_v44 = vsel %vm1044_vm1, %v1081_v22, %v1083_v35  ;;  %v2656_v35 = vld [vmem:[%s5005_s1 + $0x2a0] sm:$0xff] }
  0xb8   : > { %3195 = vmatprep.mubr.f32.mxu1 %v4373_v29  ;;  %3222 = vmatpush3.msra.mxu0 %v2612_v40  ;;  %v4457_v40 = vld [vmem:[%s4041_s8 + $0xd8] sm:$0xff] }
  0xb9   : > { %3278 = vmatpush3.msra.mxu1 %v2628_v41  ;;  %3140 = vmatmul.mubr.f32.gmra.mxu0 %v4207_v19  ;;  %v4460_v41 = vsel %vm1044_vm1, %v1080_v21, %v1081_v22  ;;  %v2659_v21 = vld [vmem:[%s5005_s1 + $0x2b8] sm:$0xff]  ;;  %v2658_v22 = vld [vmem:[%s5005_s1 + $0x2b0] sm:$0xff] }
  0xba   : > { %3196 = vmatmul.mubr.f32.gmra.mxu1 %v4379_v43  ;;  %3223 = vmatprep.subr.mxu0 %v2611_v47 }
  0xbb   : > { %3279 = vmatprep.subr.mxu1 %v2627_v49  ;;  %3224 = vmatpush3.msra.mxu0 %v2611_v47  ;;  %v2621_v47 = vld [vmem:[%s5005_s1 + $0x388] sm:$0xff] }
  0xbc   : > { %3280 = vmatpush3.msra.mxu1 %v2627_v49  ;;  %3225 = vmatprep.subr.mxu0 %v2610_v51  ;;  %v2604_v49 = vld [vmem:[%s5005_s1 + $0x200] sm:$0xff] }
  0xbd   : > { %3281 = vmatprep.subr.mxu1 %v2626_v28  ;;  %3142 = vmatprep.mubr.f32.mxu0 %v4226_v24 }
  0xbe   : > { %3198 = vmatprep.mubr.f32.mxu1 %v4401_v30  ;;  %3226 = vmatpush3.msra.mxu0 %v2610_v51  ;;  %v2651_v51 = vld [vmem:[%s5005_s1 + $0x178] sm:$0xff] }
  0xbf   : > { %3282 = vmatpush3.msra.mxu1 %v2626_v28  ;;  %3143 = vmatmul.mubr.f32.gmra.mxu0 %v4229_v25  ;;  %v2667_v28 = vld [vmem:[%s5005_s1 + $0x2f8] sm:$0xff] }
  0xc0   : > { %3199 = vmatmul.mubr.f32.gmra.mxu1 %v4407_v57  ;;  %3227 = vmatprep.subr.mxu0 %v2609_v4 }
  0xc1   : > { %3283 = vmatprep.subr.mxu1 %v2625_v5  ;;  %3228 = vmatpush3.msra.mxu0 %v2609_v4  ;;  %v2664_v4 = vld [vmem:[%s5005_s1 + $0x2e0] sm:$0xff] }
  0xc2   : > { %3284 = vmatpush3.msra.mxu1 %v2625_v5  ;;  %3229 = vmatprep.subr.mxu0 %v2608_v14  ;;  %v2663_v5 = vld [vmem:[%s5005_s1 + $0x2d8] sm:$0xff] }
  0xc3   : > { %3285 = vmatprep.subr.mxu1 %v2624_v15  ;;  %3145 = vmatprep.mubr.f32.mxu0 %v4248_v34 }
  0xc4   : > { %3201 = vmatprep.mubr.f32.mxu1 %v4429_v16  ;;  %3230 = vmatpush3.msra.mxu0 %v2608_v14  ;;  %v2661_v14 = vld [vmem:[%s5005_s1 + $0x2c8] sm:$0xff] }
  0xc5   : > { %3286 = vmatpush3.msra.mxu1 %v2624_v15  ;;  %3146 = vmatmul.mubr.f32.gmra.mxu0 %v4134_v58  ;;  %v2660_v15 = vld [vmem:[%s5005_s1 + $0x2c0] sm:$0xff]  ;;  %v2638_v58 = vld [vmem:[%s5005_s1 + $0x110] sm:$0xff] }
  0xc6   : > { %3202 = vmatmul.mubr.f32.gmra.mxu1 %v4435_v20  ;;  %3231 = vmatprep.subr.mxu0 %v2607_v32 }
  0xc7   : > { %3287 = vmatprep.subr.mxu1 %v2623_v33  ;;  %3232 = vmatpush3.msra.mxu0 %v2607_v32  ;;  %v1282_v32 = vrot.slane %v4248_v34, 1 }
  0xc8   : > { %3288 = vmatpush3.msra.mxu1 %v2623_v33  ;;  %3233 = vmatprep.subr.mxu0 %v2606_v38  ;;  %v2657_v33 = vld [vmem:[%s5005_s1 + $0x2a8] sm:$0xff] }
  0xc9   : > { %3289 = vmatprep.subr.mxu1 %v2622_v39  ;;  %3148 = vmatprep.mubr.f32.mxu0 %v4457_v40 }
  0xca   : > { %3204 = vmatprep.mubr.f32.mxu1 %v4460_v41  ;;  %3234 = vmatpush3.msra.mxu0 %v2606_v38  ;;  %v1284_v38 = vsel %vm1044_vm1, %v1282_v32, %v1283_v62  ;;  %v2654_v62 = vld [vmem:[%s5005_s1 + $0x290] sm:$0xff] }
  0xcb   : > { %3290 = vmatpush3.msra.mxu1 %v2622_v39  ;;  %3149 = vmatmul.mubr.f32.gmra.mxu0 %v4143_v61  ;;  %v2639_v39 = vld [vmem:[%s5005_s1 + $0x118] sm:$0xff]  ;;  %v2636_v61 = vld [vmem:[%s5005_s1 + $0x100] sm:$0xff] }
  0xcc   : > { %3205 = vmatmul.mubr.f32.gmra.mxu1 %v4463_v44  ;;  %3235 = vmatprep.subr.mxu0 %v2605_v46  ;;  %v3593_v32 = vld [vmem:[%s4041_s8 + $0xd0] sm:$0x3] }
  0xcd   : > { %3291 = vmatprep.subr.mxu1 %v2621_v47  ;;  %3236 = vmatpush3.msra.mxu0 %v2605_v46  ;;  %v2655_v46 = vld [vmem:[%s5005_s1 + $0x298] sm:$0xff] }
  0xce   : > { %3292 = vmatpush3.msra.mxu1 %v2621_v47  ;;  %3237 = vmatprep.subr.mxu0 %v2604_v49  ;;  %v2653_v47 = vld [vmem:[%s5005_s1 + $0x288] sm:$0xff] }
  0xcf   : > { %3293 = vmatprep.subr.mxu1 %v2620_v50  ;;  %3238 = vmatpush3.msra.mxu0 %v2604_v49  ;;  %v1666_v49 = vrot.slane %v4072_v36, 2  ;;  %v2682_v36 = vld [vmem:[%s5005_s1 + $0x470] sm:$0xff] }
  0xd0   : > { %3239 = vmatprep.mubr.f32.mxu0 %v4289_v52  ;;  %3294 = vmatpush3.msra.mxu1 %v2620_v50  ;;  %v2666_v52 = vld [vmem:[%s5005_s1 + $0x2f0] sm:$0xff]  ;;  %v1669_v50 = vrot.slane %v4292_v53, 2  ;;  %v1672_v53 = vrot.slane %v4099_v45, 2 }
  0xd1   : > { %3295 = vmatprep.mubr.f32.mxu1 %v4317_v7  ;;  %3240 = vmatmul.mubr.f32.vlgmr.msra.gmra.mxu0 %v4295_v48  ;;  %v2649_v48 = vld [vmem:[%s5005_s1 + $0x168] sm:$0xff] }
  0xd2   : > { %3296 = vmatmul.mubr.f32.vlgmr.msra.gmra.mxu1 %v4323_v9  ;;  %3319 = vmatprep.subr.mxu0 %v2651_v51 }
  0xd3   : > { %3375 = vmatprep.subr.mxu1 %v2667_v28  ;;  %3320 = vmatpush3.msra.mxu0 %v2651_v51  ;;  %v2681_v51 = vld [vmem:[%s5005_s1 + $0x468] sm:$0xff] }
  0xd4   : > { %3376 = vmatpush3.msra.mxu1 %v2667_v28  ;;  %3321 = vmatprep.subr.mxu0 %v2650_v1  ;;  %v1674_v28 = vrot.slane %v4320_v8, 2  ;;  %v1677_v8 = vrot.slane %v4140_v60, 2 }
  0xd5   : > { %3377 = vmatprep.subr.mxu1 %v2666_v52  ;;  %3242 = vmatprep.mubr.f32.mxu0 %v4317_v7  ;;  %v2648_v7 = vld [vmem:[%s5005_s1 + $0x160] sm:$0xff] }
  0xd6   : > { %3298 = vmatprep.mubr.f32.mxu1 %v4345_v23  ;;  %3322 = vmatpush3.msra.mxu0 %v2650_v1  ;;  %v2679_v1 = vld [vmem:[%s5005_s1 + $0x458] sm:$0xff] }
  0xd7   : > { %3378 = vmatpush3.msra.mxu1 %v2666_v52  ;;  %3243 = vmatmul.mubr.f32.gmra.mxu0 %v4323_v9  ;;  %v2647_v9 = vld [vmem:[%s5005_s1 + $0x158] sm:$0xff]  ;;  %v1679_v52 = vrot.slane %v4348_v26, 2  ;;  %v1681_v26 = vrot.slane %v4172_v10, 2  ;;  %v2676_v10 = vld [vmem:[%s5005_s1 + $0x440] sm:$0xff] }
  0xd8   : > { %3299 = vmatmul.mubr.f32.gmra.mxu1 %v4351_v27  ;;  %3323 = vmatprep.subr.mxu0 %v2649_v48 }
  0xd9   : > { %3379 = vmatprep.subr.mxu1 %v2665_v2  ;;  %3324 = vmatpush3.msra.mxu0 %v2649_v48  ;;  %v4669_v48 = vsel %vm1655_vm0, %v1677_v8, %v1679_v52 }
  0xda   : > { %3380 = vmatpush3.msra.mxu1 %v2665_v2  ;;  %3325 = vmatprep.subr.mxu0 %v2648_v7  ;;  %v1682_v2 = vrot.slane %v4185_v13, 2 }
  0xdb   : > { %3381 = vmatprep.subr.mxu1 %v2664_v4  ;;  %3245 = vmatprep.mubr.f32.mxu0 %v4345_v23  ;;  %v2646_v23 = vld [vmem:[%s5005_s1 + $0x150] sm:$0xff] }
  0xdc   : > { %3301 = vmatprep.mubr.f32.mxu1 %v4373_v29  ;;  %3326 = vmatpush3.msra.mxu0 %v2648_v7  ;;  %v2677_v7 = vld [vmem:[%s5005_s1 + $0x448] sm:$0xff]  ;;  %v4685_v13 = vsel %vm1655_vm0, %v1681_v26, %v1682_v2 }
  0xdd   : > { %3382 = vmatpush3.msra.mxu1 %v2664_v4  ;;  %3246 = vmatmul.mubr.f32.gmra.mxu0 %v4351_v27  ;;  %v2645_v27 = vld [vmem:[%s5005_s1 + $0x148] sm:$0xff]  ;;  %v1684_v4 = vrot.slane %v4376_v31, 2  ;;  %v1686_v31 = vrot.slane %v4204_v18, 2  ;;  %v2674_v18 = vld [vmem:[%s5005_s1 + $0x430] sm:$0xff] }
  0xde   : > { %3302 = vmatmul.mubr.f32.gmra.mxu1 %v4379_v43  ;;  %3327 = vmatprep.subr.mxu0 %v2647_v9 }
  0xdf   : > { %3383 = vmatprep.subr.mxu1 %v2663_v5  ;;  %3328 = vmatpush3.msra.mxu0 %v2647_v9  ;;  %v4688_v9 = vsel %vm1655_vm0, %v1682_v2, %v1684_v4 }
  0xe0   : > { %3384 = vmatpush3.msra.mxu1 %v2663_v5  ;;  %3329 = vmatprep.subr.mxu0 %v2646_v23  ;;  %v1687_v5 = vrot.slane %v4207_v19, 2 }
  0xe1   : > { %3385 = vmatprep.subr.mxu1 %v2662_v6  ;;  %3248 = vmatprep.mubr.f32.mxu0 %v4373_v29  ;;  %v2644_v29 = vld [vmem:[%s5005_s1 + $0x140] sm:$0xff] }
  0xe2   : > { %3304 = vmatprep.mubr.f32.mxu1 %v4401_v30  ;;  %3330 = vmatpush3.msra.mxu0 %v2646_v23  ;;  %v2675_v23 = vld [vmem:[%s5005_s1 + $0x438] sm:$0xff]  ;;  %v1688_v19 = vsel %vm1655_vm0, %v1686_v31, %v1687_v5 }
  0xe3   : > { %3386 = vmatpush3.msra.mxu1 %v2662_v6  ;;  %3249 = vmatmul.mubr.f32.gmra.mxu0 %v4379_v43  ;;  %v2643_v43 = vld [vmem:[%s5005_s1 + $0x138] sm:$0xff]  ;;  %v1689_v6 = vrot.slane %v4404_v54, 2  ;;  %v1691_v54 = vrot.slane %v4226_v24, 2  ;;  %v2672_v24 = vld [vmem:[%s5005_s1 + $0x420] sm:$0xff] }
  0xe4   : > { %3305 = vmatmul.mubr.f32.gmra.mxu1 %v4407_v57  ;;  %3331 = vmatprep.subr.mxu0 %v2645_v27 }
  0xe5   : > { %3387 = vmatprep.subr.mxu1 %v2661_v14  ;;  %3332 = vmatpush3.msra.mxu0 %v2645_v27  ;;  %v1690_v27 = vsel %vm1655_vm0, %v1687_v5, %v1689_v6 }
  0xe6   : > { %3388 = vmatpush3.msra.mxu1 %v2661_v14  ;;  %3333 = vmatprep.subr.mxu0 %v2644_v29  ;;  %v1692_v14 = vrot.slane %v4229_v25, 2 }
  0xe7   : > { %3389 = vmatprep.subr.mxu1 %v2660_v15  ;;  %3251 = vmatprep.mubr.f32.mxu0 %v4401_v30  ;;  %v2642_v30 = vld [vmem:[%s5005_s1 + $0x130] sm:$0xff] }
  0xe8   : > { %3307 = vmatprep.mubr.f32.mxu1 %v4429_v16  ;;  %3334 = vmatpush3.msra.mxu0 %v2644_v29  ;;  %v2673_v29 = vld [vmem:[%s5005_s1 + $0x428] sm:$0xff]  ;;  %v1693_v25 = vsel %vm1655_vm0, %v1691_v54, %v1692_v14 }
  0xe9   : > { %3390 = vmatpush3.msra.mxu1 %v2660_v15  ;;  %3252 = vmatmul.mubr.f32.gmra.mxu0 %v4407_v57  ;;  %v2641_v57 = vld [vmem:[%s5005_s1 + $0x128] sm:$0xff]  ;;  %v1694_v15 = vrot.slane %v4432_v17, 2  ;;  %v1890_v17 = vrot.slane %v4248_v34, 2 }
  0xea   : > { %3308 = vmatmul.mubr.f32.gmra.mxu1 %v4435_v20  ;;  %3335 = vmatprep.subr.mxu0 %v2643_v43 }
  0xeb   : > { %3391 = vmatprep.subr.mxu1 %v2659_v21  ;;  %3336 = vmatpush3.msra.mxu0 %v2643_v43  ;;  %v1695_v43 = vsel %vm1655_vm0, %v1692_v14, %v1694_v15 }
  0xec   : > { %3392 = vmatpush3.msra.mxu1 %v2659_v21  ;;  %3337 = vmatprep.subr.mxu0 %v2642_v30  ;;  %v3592_v21 = vld [vmem:[%s4041_s8 + $0xc8] sm:$0xff] }
  0xed   : > { %3393 = vmatprep.subr.mxu1 %v2658_v22  ;;  %3254 = vmatprep.mubr.f32.mxu0 %v4429_v16  ;;  %v2640_v16 = vld [vmem:[%s5005_s1 + $0x120] sm:$0xff] }
  0xee   : > { %3310 = vmatprep.mubr.f32.mxu1 %v4460_v41  ;;  %3338 = vmatpush3.msra.mxu0 %v2642_v30  ;;  %v1891_v30 = vrot.slane %v3592_v21, 2 }
  0xef   : > { %3394 = vmatpush3.msra.mxu1 %v2658_v22  ;;  %3255 = vmatmul.mubr.f32.gmra.mxu0 %v4435_v20  ;;  %v1470_v20 = vrot.slane %v4457_v40, 1  ;;  %v2671_v22 = vld [vmem:[%s5005_s1 + $0x418] sm:$0xff] }
  0xf0   : > { %3311 = vmatmul.mubr.f32.gmra.mxu1 %v4463_v44  ;;  %3339 = vmatprep.subr.mxu0 %v2641_v57  ;;  %v1892_v34 = vsel %vm1655_vm0, %v1890_v17, %v1891_v30 }
  0xf1   : > { %3395 = vmatprep.subr.mxu1 %v2657_v33  ;;  %3340 = vmatpush3.msra.mxu0 %v2641_v57  ;;  %v1893_v57 = vrot.slane %v3593_v32, 2 }
  0xf2   : > { %3396 = vmatpush3.msra.mxu1 %v2657_v33  ;;  %3341 = vmatprep.subr.mxu0 %v2640_v16  ;;  %v2670_v33 = vld [vmem:[%s5005_s1 + $0x410] sm:$0xff] }
  0xf3   : > { %3397 = vmatprep.subr.mxu1 %v2656_v35  ;;  %3257 = vmatprep.mubr.f32.mxu0 %v4460_v41  ;;  %v1472_v41 = vsel %vm1044_vm1, %v1470_v20, %v1471_v3  ;;  %v2652_v3 = vld [vmem:[%s5005_s1 + $0x280] sm:$0xff] }
  0xf4   : > { %3313 = vmatprep.mubr.f32.mxu1 %v1284_v38  ;;  %3342 = vmatpush3.msra.mxu0 %v2640_v16  ;;  %v1894_v16 = vsel %vm1655_vm0, %v1891_v30, %v1893_v57 }
  0xf5   : > { %3398 = vmatpush3.msra.mxu1 %v2656_v35  ;;  %3258 = vmatmul.mubr.f32.gmra.mxu0 %v4463_v44  ;;  %v2637_v44 = vld [vmem:[%s5005_s1 + $0x108] sm:$0xff] }
  0xf6   : > { %3314 = vmatmul.mubr.f32.gmra.mxu1 %v4177_v11  ;;  %3343 = vmatprep.subr.mxu0 %v2639_v39  ;;  %v2669_v35 = vld [vmem:[%s5005_s1 + $0x408] sm:$0xff] }
  0xf7   : > { %3399 = vmatprep.subr.mxu1 %v2655_v46  ;;  %3344 = vmatpush3.msra.mxu0 %v2639_v39 }
  0xf8   : > { %3400 = vmatpush3.msra.mxu1 %v2655_v46  ;;  %3345 = vmatprep.subr.mxu0 %v2638_v58 }
  0xf9   : > { %3401 = vmatprep.subr.mxu1 %v2654_v62  ;;  %3260 = vmatprep.mubr.f32.mxu0 %v1284_v38  ;;  %v2668_v38 = vld [vmem:[%s5005_s1 + $0x400] sm:$0xff] }
  0xfa   : > { %3316 = vmatprep.mubr.f32.mxu1 %v1472_v41  ;;  %3346 = vmatpush3.msra.mxu0 %v2638_v58  ;;  %v2075_v58 = vrot.slane %v4457_v40, 2 }
  0xfb   : > { %3402 = vmatpush3.msra.mxu1 %v2654_v62  ;;  %3261 = vmatmul.mubr.f32.gmra.mxu0 %v4177_v11  ;;  %v1667_v11 = vrot.slane %v4075_v37, 2  ;;  %v3594_v62 = vld [vmem:[%s4041_s8 + $0xe0] sm:$0xff] }
  0xfc   : > { %3317 = vmatmul.mubr.f32.gmra.mxu1 %v4182_v12  ;;  %3347 = vmatprep.subr.mxu0 %v2637_v44  ;;  %v2683_v12 = vld [vmem:[%s5005_s1 + $0x478] sm:$0xff]  ;;  %v2076_v41 = vrot.slane %v3594_v62, 2 }
  0xfd   : > { %3403 = vmatprep.subr.mxu1 %v2653_v47  ;;  %3348 = vmatpush3.msra.mxu0 %v2637_v44  ;;  %v4628_v37 = vsel %vm1655_vm0, %v1666_v49, %v1667_v11 }
  0xfe   : > { %3404 = vmatpush3.msra.mxu1 %v2653_v47  ;;  %3349 = vmatprep.subr.mxu0 %v2636_v61 }
  0xff   : > { %3405 = vmatprep.subr.mxu1 %v2652_v3  ;;  %3350 = vmatpush3.msra.mxu0 %v2636_v61 }
 0x100   : > { %3351 = vmatprep.mubr.f32.mxu0 %v4130_v56  ;;  %3406 = vmatpush3.msra.mxu1 %v2652_v3  ;;  %v4631_v56 = vsel %vm1655_vm0, %v1667_v11, %v1669_v50  ;;  %v3595_v3 = vld [vmem:[%s4041_s8 + $0xe8] sm:$0x3]  ;;  %v2077_v11 = vsel %vm1655_vm0, %v2075_v58, %v2076_v41  ;;  %s3602_s8 = scalar_lea.vmem %s3601_s24, 4096 }
 0x101   : > { %3407 = vmatprep.mubr.f32.mxu1 %v4137_v59  ;;  %3352 = vmatmul.mubr.f32.vlgmr.msra.gmra.mxu0 %v4147_v63  ;;  %v1671_v63 = vrot.slane %v4094_v42, 2  ;;  %v2680_v42 = vld [vmem:[%s5005_s1 + $0x460] sm:$0xff]  ;;  %v2078_v49 = vrot.slane %v3595_v3, 2  ;;  %p3604_p7 = scmp.lt.s32.totalorder %s3602_s8, %s3596_s20 }
 0x102   : > { %3408 = vmatmul.mubr.f32.vlgmr.msra.gmra.mxu1 %v4150_v0  ;;  %3431 = vmatprep.subr.mxu0 %v2683_v12 }
 0x103   : > { %3487 = vmatprep.subr.mxu1 %v2683_v12  ;;  %3432 = vmatpush3.msra.mxu0 %v2683_v12  ;;  %v4647_v45 = vsel %vm1655_vm0, %v1671_v63, %v1672_v53  ;;  %p3605_p9 = por %p3604_p7, %p3603_p6 }
 0x104   : > { %3503 = vmatpush3.msra.mxu1 %v2683_v12  ;;  %3433 = vmatprep.subr.mxu0 %v2682_v36 }
 0x105   : > { %3488 = vmatprep.subr.mxu1 %v2682_v36  ;;  %3354 = vmatprep.mubr.f32.mxu0 %v4137_v59  ;;  %v4650_v59 = vsel %vm1655_vm0, %v1672_v53, %v1674_v28  ;;  %p3606_p10 = pnand %p3605_p9, %p3599_p5 }
 0x106   : > { %3410 = vmatprep.mubr.f32.mxu1 %v4628_v37  ;;  %3434 = vmatpush3.msra.mxu0 %v2682_v36 }
 0x107   : > { %3504 = vmatpush3.msra.mxu1 %v2682_v36  ;;  %3355 = vmatmul.mubr.f32.gmra.mxu0 %v4150_v0  ;;  %v1676_v0 = vrot.slane %v4127_v55, 2  ;;  %v2678_v55 = vld [vmem:[%s5005_s1 + $0x450] sm:$0xff] }
 0x108   : > { %3411 = vmatmul.mubr.f32.gmra.mxu1 %v4631_v56  ;;  %3435 = vmatprep.subr.mxu0 %v2681_v51 }
 0x109   : > { %3489 = vmatprep.subr.mxu1 %v2681_v51  ;;  %3436 = vmatpush3.msra.mxu0 %v2681_v51  ;;  %v4666_v60 = vsel %vm1655_vm0, %v1676_v0, %v1677_v8 }
 0x10a   : > { %3505 = vmatpush3.msra.mxu1 %v2681_v51  ;;  %3437 = vmatprep.subr.mxu0 %v2680_v42 }
 0x10b   : > { %3490 = vmatprep.subr.mxu1 %v2680_v42  ;;  %3357 = vmatprep.mubr.f32.mxu0 %v4628_v37 }
 0x10c   : > { %3413 = vmatprep.mubr.f32.mxu1 %v4647_v45  ;;  %3438 = vmatpush3.msra.mxu0 %v2680_v42 }
 0x10d   : > { %3506 = vmatpush3.msra.mxu1 %v2680_v42  ;;  %3358 = vmatmul.mubr.f32.gmra.mxu0 %v4631_v56 }
 0x10e   : > { %3414 = vmatmul.mubr.f32.gmra.mxu1 %v4650_v59  ;;  %3439 = vmatprep.subr.mxu0 %v2679_v1 }
 0x10f   : > { %3491 = vmatprep.subr.mxu1 %v2679_v1  ;;  %3440 = vmatpush3.msra.mxu0 %v2679_v1 }
 0x110   : > { %3507 = vmatpush3.msra.mxu1 %v2679_v1  ;;  %3441 = vmatprep.subr.mxu0 %v2678_v55 }
 0x111   : > { %3492 = vmatprep.subr.mxu1 %v2678_v55  ;;  %3360 = vmatprep.mubr.f32.mxu0 %v4647_v45 }
 0x112   : > { %3416 = vmatprep.mubr.f32.mxu1 %v4666_v60  ;;  %3442 = vmatpush3.msra.mxu0 %v2678_v55 }
 0x113   : > { %3508 = vmatpush3.msra.mxu1 %v2678_v55  ;;  %3361 = vmatmul.mubr.f32.gmra.mxu0 %v4650_v59 }
 0x114   : > { %3417 = vmatmul.mubr.f32.gmra.mxu1 %v4669_v48  ;;  %3443 = vmatprep.subr.mxu0 %v2677_v7 }
 0x115   : > { %3493 = vmatprep.subr.mxu1 %v2677_v7  ;;  %3444 = vmatpush3.msra.mxu0 %v2677_v7 }
 0x116   : > { %3509 = vmatpush3.msra.mxu1 %v2677_v7  ;;  %3445 = vmatprep.subr.mxu0 %v2676_v10 }
 0x117   : > { %3494 = vmatprep.subr.mxu1 %v2676_v10  ;;  %3363 = vmatprep.mubr.f32.mxu0 %v4666_v60 }
 0x118   : > { %3419 = vmatprep.mubr.f32.mxu1 %v4685_v13  ;;  %3446 = vmatpush3.msra.mxu0 %v2676_v10 }
 0x119   : > { %3510 = vmatpush3.msra.mxu1 %v2676_v10  ;;  %3364 = vmatmul.mubr.f32.gmra.mxu0 %v4669_v48 }
 0x11a   : > { %3420 = vmatmul.mubr.f32.gmra.mxu1 %v4688_v9  ;;  %3447 = vmatprep.subr.mxu0 %v2675_v23 }
 0x11b   : > { %3495 = vmatprep.subr.mxu1 %v2675_v23  ;;  %3448 = vmatpush3.msra.mxu0 %v2675_v23 }
 0x11c   : > { %3511 = vmatpush3.msra.mxu1 %v2675_v23  ;;  %3449 = vmatprep.subr.mxu0 %v2674_v18 }
 0x11d   : > { %3496 = vmatprep.subr.mxu1 %v2674_v18  ;;  %3366 = vmatprep.mubr.f32.mxu0 %v4685_v13 }
 0x11e   : > { %3422 = vmatprep.mubr.f32.mxu1 %v1688_v19  ;;  %3450 = vmatpush3.msra.mxu0 %v2674_v18 }
 0x11f   : > { %3512 = vmatpush3.msra.mxu1 %v2674_v18  ;;  %3367 = vmatmul.mubr.f32.gmra.mxu0 %v4688_v9 }
 0x120   : > { %3423 = vmatmul.mubr.f32.gmra.mxu1 %v1690_v27  ;;  %3451 = vmatprep.subr.mxu0 %v2673_v29 }
 0x121   : > { %3497 = vmatprep.subr.mxu1 %v2673_v29  ;;  %3452 = vmatpush3.msra.mxu0 %v2673_v29 }
 0x122   : > { %3513 = vmatpush3.msra.mxu1 %v2673_v29  ;;  %3453 = vmatprep.subr.mxu0 %v2672_v24 }
 0x123   : > { %3498 = vmatprep.subr.mxu1 %v2672_v24  ;;  %3369 = vmatprep.mubr.f32.mxu0 %v1688_v19 }
 0x124   : > { %3425 = vmatprep.mubr.f32.mxu1 %v1693_v25  ;;  %3454 = vmatpush3.msra.mxu0 %v2672_v24 }
 0x125   : > { %3514 = vmatpush3.msra.mxu1 %v2672_v24  ;;  %3370 = vmatmul.mubr.f32.gmra.mxu0 %v1690_v27 }
 0x126   : > { %3426 = vmatmul.mubr.f32.gmra.mxu1 %v1695_v43  ;;  %3455 = vmatprep.subr.mxu0 %v2671_v22 }
 0x127   : > { %3499 = vmatprep.subr.mxu1 %v2671_v22  ;;  %3456 = vmatpush3.msra.mxu0 %v2671_v22 }
 0x128   : > { %3515 = vmatpush3.msra.mxu1 %v2671_v22  ;;  %3457 = vmatprep.subr.mxu0 %v2670_v33 }
 0x129   : > { %3500 = vmatprep.subr.mxu1 %v2670_v33  ;;  %3372 = vmatprep.mubr.f32.mxu0 %v1693_v25 }
 0x12a   : > { %3428 = vmatprep.mubr.f32.mxu1 %v1892_v34  ;;  %3458 = vmatpush3.msra.mxu0 %v2670_v33 }
 0x12b   : > { %3516 = vmatpush3.msra.mxu1 %v2670_v33  ;;  %3373 = vmatmul.mubr.f32.gmra.mxu0 %v1695_v43 }
 0x12c   : > { %3429 = vmatmul.mubr.f32.gmra.mxu1 %v1894_v16  ;;  %3459 = vmatprep.subr.mxu0 %v2669_v35 }
 0x12d   : > { %3501 = vmatprep.subr.mxu1 %v2669_v35  ;;  %3460 = vmatpush3.msra.mxu0 %v2669_v35 }
 0x12e   : > { %3517 = vmatpush3.msra.mxu1 %v2669_v35  ;;  %3461 = vmatprep.subr.mxu0 %v2668_v38 }
 0x12f   : > { %3502 = vmatprep.subr.mxu1 %v2668_v38  ;;  %3462 = vmatpush3.msra.mxu0 %v2668_v38 }
 0x130   : > { %3518 = vmatpush3.msra.mxu1 %v2668_v38  ;;  %3463 = vmatprep.mubr.f32.mxu0 %v4628_v37 }
 0x131   : > { %3475 = vmatprep.mubr.f32.mxu1 %v1688_v19  ;;  %3464 = vmatmul.mubr.f32.vlgmr.msra.gmra.mxu0 %v4631_v56  ;;  %v3017_v20 = vpop.f32.mrf.mxu0  ;;  %v2079_v56 = vsel %vm1655_vm0, %v2076_v41, %v2078_v49 }
 0x132   : > { %3476 = vmatmul.mubr.f32.vlgmr.msra.gmra.mxu1 %v1690_v27  ;;  %v3073_v39 = vpop.f32.mrf.mxu1  ;;  %3466 = vmatprep.mubr.f32.mxu0 %v4647_v45 }
 0x133   : > { %3478 = vmatprep.mubr.f32.mxu1 %v1693_v25  ;;  %v4738_v46 = vadd.f32 %v3073_v39, %v3017_v20  ;;  %v618_v44 = vpop.f32.mrf.mxu0 }
 0x134   : > { %v763_v47 = vpop.f32.mrf.mxu1 }
 0x135   : > { %v4742_v61 = vadd.f32 %v763_v47, %v618_v44  ;;  %3467 = vmatmul.mubr.f32.gmra.mxu0 %v4650_v59 }
 0x136   : > { %3479 = vmatmul.mubr.f32.gmra.mxu1 %v1695_v43  ;;  %3469 = vmatprep.mubr.f32.mxu0 %v4666_v60 }
 0x137   : > { %3481 = vmatprep.mubr.f32.mxu1 %v1892_v34  ;;  %v3020_v12 = vpop.f32.mrf.mxu0 }
 0x138   : > { %v3076_v50 = vpop.f32.mrf.mxu1 }
 0x139   : > { %v779_v36 = vadd.f32 %v3076_v50, %v3020_v12  ;;  %3470 = vmatmul.mubr.f32.gmra.mxu0 %v4669_v48  ;;  %v628_v40 = vpop.f32.mrf.mxu0 }
 0x13a   : > { %3482 = vmatmul.mubr.f32.gmra.mxu1 %v1894_v16  ;;  %v773_v37 = vpop.f32.mrf.mxu1  ;;  %3472 = vmatprep.mubr.f32.mxu0 %v4685_v13 }
 0x13b   : > { %3484 = vmatprep.mubr.f32.mxu1 %v2077_v11  ;;  %v774_v63 = vadd.f32 %v773_v37, %v628_v40 }
 0x13d   : > { %3473 = vmatmul.mubr.f32.gmra.mxu0 %v4688_v9  ;;  %v3023_v53 = vpop.f32.mrf.mxu0 }
 0x13e   : > { %3485 = vmatmul.mubr.f32.gmra.mxu1 %v2079_v56  ;;  %v3079_v51 = vpop.f32.mrf.mxu1 }
 0x13f   : > { %v789_v28 = vadd.f32 %v3079_v51, %v3023_v53  ;;  %v638_v42 = vpop.f32.mrf.mxu0 }
 0x140   : > { %v783_v45 = vpop.f32.mrf.mxu1 }
 0x141   : > { %v784_v59 = vadd.f32 %v783_v45, %v638_v42 }
 0x143   : > { %v3026_v0 = vpop.f32.mrf.mxu0 }
 0x144   : > { %v3082_v8 = vpop.f32.mrf.mxu1 }
 0x145   : > { %v799_v1 = vadd.f32 %v3082_v8, %v3026_v0  ;;  %v648_v52 = vpop.f32.mrf.mxu0 }
 0x146   : > { %v793_v55 = vpop.f32.mrf.mxu1 }
 0x147   : > { %v794_v60 = vadd.f32 %v793_v55, %v648_v52 }
 0x149   : > { %v3029_v48 = vpop.f32.mrf.mxu0 }
 0x14a   : > { %v3085_v26 = vpop.f32.mrf.mxu1 }
 0x14b   : > { %v809_v2 = vadd.f32 %v3085_v26, %v3029_v48  ;;  %v658_v7 = vpop.f32.mrf.mxu0 }
 0x14c   : > { %v803_v4 = vpop.f32.mrf.mxu1 }
 0x14d   : > { %v804_v10 = vadd.f32 %v803_v4, %v658_v7 }
 0x14f   : > { %v3032_v13 = vpop.f32.mrf.mxu0 }
 0x150   : > { %v3088_v9 = vpop.f32.mrf.mxu1 }
 0x151   : > { %v819_v31 = vadd.f32 %v3088_v9, %v3032_v13  ;;  %v668_v5 = vpop.f32.mrf.mxu0 }
 0x152   : > { %v813_v23 = vpop.f32.mrf.mxu1 }
 0x153   : > { %v814_v6 = vadd.f32 %v813_v23, %v668_v5 }
 0x155   : > { %v3035_v18 = vpop.f32.mrf.mxu0 }
 0x156   : > { %v3091_v19 = vpop.f32.mrf.mxu1 }
 0x157   : > { %v829_v27 = vadd.f32 %v3091_v19, %v3035_v18  ;;  %v678_v54 = vpop.f32.mrf.mxu0 }
 0x158   : > { %v823_v14 = vpop.f32.mrf.mxu1 }
 0x159   : > { %v824_v29 = vadd.f32 %v823_v14, %v678_v54 }
 0x15b   : > { %v3038_v15 = vpop.f32.mrf.mxu0 }
 0x15c   : > { %v3094_v24 = vpop.f32.mrf.mxu1 }
 0x15d   : > { %v839_v25 = vadd.f32 %v3094_v24, %v3038_v15  ;;  %v688_v43 = vpop.f32.mrf.mxu0 }
 0x15e   : > { %v833_v17 = vpop.f32.mrf.mxu1 }
 0x15f   : > { %v4752_v21 = vadd.f32 %v833_v17, %v688_v43 }
 0x161   : > { %v3129_v30 = vpop.f32.mrf.mxu0 }
 0x162   : > { %v3185_v22 = vpop.f32.mrf.mxu1  ;;  %v1005_v32 = vadd.f32 %v3129_v30, %v4738_v46 }
 0x163   : > { %v925_v57 = vpop.f32.mrf.mxu0 }
 0x164   : > { %v1184_v33 = vpop.f32.mrf.mxu1  ;;  %v4755_v34 = vadd.f32 %v3185_v22, %v1005_v32  ;;  %v1004_v16 = vadd.f32 %v925_v57, %v4742_v61 }
 0x166   : > { %v4758_v35 = vadd.f32 %v1184_v33, %v1004_v16 }
 0x167   : > { %v3132_v38 = vpop.f32.mrf.mxu0 }
 0x168   : > { %v3188_v20 = vpop.f32.mrf.mxu1  ;;  %v1007_v39 = vadd.f32 %v3132_v38, %v779_v36 }
 0x169   : > { %v935_v58 = vpop.f32.mrf.mxu0 }
 0x16a   : > { %v1194_v62 = vpop.f32.mrf.mxu1  ;;  %v4760_v41 = vadd.f32 %v3188_v20, %v1007_v39  ;;  %v1006_v44 = vadd.f32 %v935_v58, %v774_v63 }
 0x16c   : > { %v4762_v47 = vadd.f32 %v1194_v62, %v1006_v44 }
 0x16d   : > { %v3135_v3 = vpop.f32.mrf.mxu0 }
 0x16e   : > { %v3191_v46 = vpop.f32.mrf.mxu1  ;;  %v1009_v49 = vadd.f32 %v3135_v3, %v789_v28 }
 0x16f   : > { %v945_v11 = vpop.f32.mrf.mxu0 }
 0x170   : > { %v1204_v12 = vpop.f32.mrf.mxu1  ;;  %v4764_v50 = vadd.f32 %v3191_v46, %v1009_v49  ;;  %v1008_v61 = vadd.f32 %v945_v11, %v784_v59 }
 0x172   : > { %v4766_v40 = vadd.f32 %v1204_v12, %v1008_v61 }
 0x173   : > { %v3138_v37 = vpop.f32.mrf.mxu0 }
 0x174   : > { %v3194_v56 = vpop.f32.mrf.mxu1  ;;  %v1011_v36 = vadd.f32 %v3138_v37, %v799_v1 }
 0x175   : > { %v955_v53 = vpop.f32.mrf.mxu0 }
 0x176   : > { %v1214_v51 = vpop.f32.mrf.mxu1  ;;  %v4768_v42 = vadd.f32 %v3194_v56, %v1011_v36  ;;  %v1010_v63 = vadd.f32 %v955_v53, %v794_v60 }
 0x178   : > { %v4770_v45 = vadd.f32 %v1214_v51, %v1010_v63 }
 0x179   : > { %v3141_v0 = vpop.f32.mrf.mxu0 }
 0x17a   : > { %v3197_v8 = vpop.f32.mrf.mxu1  ;;  %v1013_v28 = vadd.f32 %v3141_v0, %v809_v2 }
 0x17b   : > { %v965_v52 = vpop.f32.mrf.mxu0 }
 0x17c   : > { %v1224_v55 = vpop.f32.mrf.mxu1  ;;  %v4772_v48 = vadd.f32 %v3197_v8, %v1013_v28  ;;  %v1012_v59 = vadd.f32 %v965_v52, %v804_v10 }
 0x17e   : > { %v4774_v26 = vadd.f32 %v1224_v55, %v1012_v59 }
 0x17f   : > { %v3144_v7 = vpop.f32.mrf.mxu0 }
 0x180   : > { %v3200_v4 = vpop.f32.mrf.mxu1  ;;  %v1015_v1 = vadd.f32 %v3144_v7, %v819_v31 }
 0x181   : > { %v975_v13 = vpop.f32.mrf.mxu0 }
 0x182   : > { %v1234_v9 = vpop.f32.mrf.mxu1  ;;  %v4776_v5 = vadd.f32 %v3200_v4, %v1015_v1  ;;  %v1014_v60 = vadd.f32 %v975_v13, %v814_v6 }
 0x184   : > { %v4778_v23 = vadd.f32 %v1234_v9, %v1014_v60 }
 0x185   : > { %v3147_v18 = vpop.f32.mrf.mxu0 }
 0x186   : > { %v3203_v19 = vpop.f32.mrf.mxu1  ;;  %v1017_v2 = vadd.f32 %v3147_v18, %v829_v27 }
 0x187   : > { %v985_v54 = vpop.f32.mrf.mxu0 }
 0x188   : > { %v1244_v14 = vpop.f32.mrf.mxu1  ;;  %v4780_v15 = vadd.f32 %v3203_v19, %v1017_v2  ;;  %v1016_v10 = vadd.f32 %v985_v54, %v824_v29 }
 0x18a   : > { %v4782_v24 = vadd.f32 %v1244_v14, %v1016_v10 }
 0x18b   : > { %v3150_v43 = vpop.f32.mrf.mxu0 }
 0x18c   : > { %v3206_v17 = vpop.f32.mrf.mxu1  ;;  %v1019_v31 = vadd.f32 %v3150_v43, %v839_v25 }
 0x18d   : > { %v995_v30 = vpop.f32.mrf.mxu0 }
 0x18e   : > { %v1254_v22 = vpop.f32.mrf.mxu1  ;;  %v4784_v32 = vadd.f32 %v3206_v17, %v1019_v31  ;;  %v1018_v6 = vadd.f32 %v995_v30, %v4752_v21 }
 0x190   : > { %v4787_v57 = vadd.f32 %v1254_v22, %v1018_v6 }
 0x191   : > { %v3241_v33 = vpop.f32.mrf.mxu0 }
 0x192   : > { %v4789_v27 = vpop.f32.mrf.mxu1 }
 0x193   : > { %v1372_v16 = vpop.f32.mrf.mxu0 }
 0x194   : > { %v4791_v38 = vpop.f32.mrf.mxu1 }
 0x197   : > { %v3244_v29 = vpop.f32.mrf.mxu0 }
 0x198   : > { %v4793_v20 = vpop.f32.mrf.mxu1 }
 0x199   : > { %v1382_v39 = vpop.f32.mrf.mxu0 }
 0x19a   : > { %v4795_v58 = vpop.f32.mrf.mxu1 }
 0x19d   : > { %v3247_v25 = vpop.f32.mrf.mxu0 }
 0x19e   : > { %v4797_v62 = vpop.f32.mrf.mxu1 }
 0x19f   : > { %v1392_v44 = vpop.f32.mrf.mxu0 }
 0x1a0   : > { %v4799_v3 = vpop.f32.mrf.mxu1 }
 0x1a3   : > { %v3250_v21 = vpop.f32.mrf.mxu0 }
 0x1a4   : > { %v4801_v46 = vpop.f32.mrf.mxu1 }
 0x1a5   : > { %v1402_v49 = vpop.f32.mrf.mxu0 }
 0x1a6   : > { %v4803_v11 = vpop.f32.mrf.mxu1 }
 0x1a9   : > { %v3253_v12 = vpop.f32.mrf.mxu0 }
 0x1aa   : > { %v3309_v61 = vpop.f32.mrf.mxu1 }
 0x1ab   : > { %v1412_v37 = vpop.f32.mrf.mxu0 }
 0x1ac   : > { %v1600_v56 = vpop.f32.mrf.mxu1 }
 0x1af   : > { %v3256_v36 = vpop.f32.mrf.mxu0 }
 0x1b0   : > { %v4805_v53 = vpop.f32.mrf.mxu1 }
 0x1b1   : > { %v1422_v51 = vpop.f32.mrf.mxu0 }
 0x1b2   : > { %v4807_v63 = vpop.f32.mrf.mxu1 }
 0x1b3   : > { %5010 = vst [vmem:[#allocation10_spill] sm:$0xff] %v4807_v63 }
 0x1b5   : > { %v3259_v0 = vpop.f32.mrf.mxu0 }
 0x1b6   : > { %v4809_v8 = vpop.f32.mrf.mxu1 }
 0x1b7   : > { %5011 = vst [vmem:[#allocation11_spill] sm:$0xff] %v4809_v8  ;;  %v1432_v28 = vpop.f32.mrf.mxu0 }
 0x1b8   : > { %v4811_v52 = vpop.f32.mrf.mxu1 }
 0x1b9   : > { %5012 = vst [vmem:[#allocation12_spill] sm:$0xff] %v4811_v52  ;;  %v1459_v52 = vadd.f32 %v1412_v37, %v4774_v26 }
 0x1ba   : > { %v5029_v37 = vld [vmem:[#allocation10_spill] sm:$0xff] }
 0x1bb   : > { %v3262_v55 = vpop.f32.mrf.mxu0 }
 0x1bc   : > { %v4813_v59 = vpop.f32.mrf.mxu1 }
 0x1bd   : > { %5013 = vst [vmem:[#allocation13_spill] sm:$0xff] %v4813_v59  ;;  %v1442_v7 = vpop.f32.mrf.mxu0 }
 0x1be   : > { %v4815_v4 = vpop.f32.mrf.mxu1 }
 0x1bf   : > { %5014 = vst [vmem:[#allocation14_spill] sm:$0xff] %v4815_v4 }
 0x1c1   : > { %v3353_v1 = vpop.f32.mrf.mxu0 }
 0x1c2   : > { %v4817_v13 = vpop.f32.mrf.mxu1 }
 0x1c3   : > { %5015 = vst [vmem:[#allocation15_spill] sm:$0xff] %v4817_v13  ;;  %v1795_v9 = vpop.f32.mrf.mxu0 }
 0x1c4   : > { %v4819_v60 = vpop.f32.mrf.mxu1 }
 0x1c5   : > { %5016 = vst [vmem:[#allocation16_spill] sm:$0xff] %v4819_v60 }
 0x1c7   : > { %v3356_v18 = vpop.f32.mrf.mxu0 }
 0x1c8   : > { %v4821_v19 = vpop.f32.mrf.mxu1 }
 0x1c9   : > { %5017 = vst [vmem:[#allocation17_spill] sm:$0xff] %v4821_v19  ;;  %v4823_v2 = vpop.f32.mrf.mxu0 }
 0x1ca   : > { %5018 = vst [vmem:[#allocation18_spill] sm:$0xff] %v4823_v2  ;;  %v4825_v54 = vpop.f32.mrf.mxu1 }
 0x1cb   : > { %5019 = vst [vmem:[#allocation19_spill] sm:$0xff] %v4825_v54 }
 0x1cd   : > { %v4827_v14 = vpop.f32.mrf.mxu0 }
 0x1ce   : > { %5020 = vst [vmem:[#allocation20_spill] sm:$0xff] %v4827_v14  ;;  %v4829_v10 = vpop.f32.mrf.mxu1 }
 0x1cf   : > { %5021 = vst [vmem:[#allocation21_spill] sm:$0xff] %v4829_v10  ;;  %v4831_v43 = vpop.f32.mrf.mxu0 }
 0x1d0   : > { %5022 = vst [vmem:[#allocation22_spill] sm:$0xff] %v4831_v43  ;;  %v4833_v17 = vpop.f32.mrf.mxu1  ;;  %v1452_v43 = vadd.f32 %v3241_v33, %v4755_v34  ;;  %v1462_v33 = vadd.f32 %v3256_v36, %v4776_v5  ;;  %v1463_v5 = vadd.f32 %v1432_v28, %v4782_v24 }
 0x1d1   : > { %5023 = vst [vmem:[#allocation23_spill] sm:$0xff] %v4833_v17  ;;  %v1451_v17 = vadd.f32 %v1372_v16, %v4758_v35  ;;  %v1456_v35 = vadd.f32 %v3247_v25, %v4764_v50  ;;  %v1464_v50 = vadd.f32 %v3259_v0, %v4780_v15  ;;  %v5032_v0 = vld [vmem:[#allocation15_spill] sm:$0xff] }
 0x1d3   : > { %v4835_v31 = vpop.f32.mrf.mxu0  ;;  %v1639_v34 = vadd.f32 %v4791_v38, %v1451_v17 }
 0x1d4   : > { %5024 = vst [vmem:[#allocation24_spill] sm:$0xff] %v4835_v31  ;;  %v4837_v30 = vpop.f32.mrf.mxu1 }
 0x1d5   : > { %5025 = vst [vmem:[#allocation25_spill] sm:$0xff] %v4837_v30  ;;  %v4839_v22 = vpop.f32.mrf.mxu0  ;;  %v1454_v30 = vadd.f32 %v3244_v29, %v4760_v41  ;;  %v1455_v41 = vadd.f32 %v1392_v44, %v4766_v40  ;;  %v1457_v29 = vadd.f32 %v1402_v49, %v4770_v45  ;;  %v1644_v40 = vadd.f32 %v4797_v62, %v1456_v35 }
 0x1d6   : > { %5026 = vst [vmem:[#allocation26_spill] sm:$0xff] %v4839_v22  ;;  %v4841_v6 = vpop.f32.mrf.mxu1  ;;  %v1453_v22 = vadd.f32 %v1382_v39, %v4762_v47  ;;  %v1647_v39 = vadd.f32 %v1600_v56, %v1459_v52  ;;  %v1465_v45 = vadd.f32 %v1442_v7, %v4787_v57  ;;  %v1874_v49 = vadd.f32 %v1795_v9, %v1639_v34 }
 0x1d7   : > { %5027 = vst [vmem:[#allocation27_spill] sm:$0xff] %v4841_v6  ;;  %v1460_v6 = vadd.f32 %v3253_v12, %v4772_v48  ;;  %v1642_v16 = vadd.f32 %v4793_v20, %v1454_v30  ;;  %v1458_v48 = vadd.f32 %v3250_v21, %v4768_v42  ;;  %v1650_v42 = vadd.f32 %v4805_v53, %v1462_v33  ;;  %v5030_v53 = vld [vmem:[#allocation11_spill] sm:$0xff] }
 0x1d8   : > { %v1641_v26 = vadd.f32 %v4795_v58, %v1453_v22  ;;  %v1466_v58 = vadd.f32 %v3262_v55, %v4784_v32  ;;  %v1643_v21 = vadd.f32 %v4799_v3, %v1455_v41  ;;  %v1652_v32 = vadd.f32 %v5030_v53, %v1464_v50  ;;  %v5033_v55 = vld [vmem:[#allocation13_spill] sm:$0xff]  ;;  %v5034_v3 = vld [vmem:[#allocation14_spill] sm:$0xff] }
 0x1d9   : > { %v3365_v19 = vpop.f32.mrf.mxu0  ;;  %v1648_v47 = vadd.f32 %v3309_v61, %v1460_v6  ;;  %v1646_v15 = vadd.f32 %v4801_v46, %v1458_v48  ;;  %v1645_v61 = vadd.f32 %v4803_v11, %v1457_v29  ;;  %v1877_v56 = vadd.f32 %v3356_v18, %v1642_v16  ;;  %v5035_v46 = vld [vmem:[#allocation18_spill] sm:$0xff]  ;;  %v5036_v18 = vld [vmem:[#allocation16_spill] sm:$0xff]  ;;  %v5039_v29 = vld [vmem:[#allocation19_spill] sm:$0xff] }
 0x1da   : > { %v3421_v60 = vpop.f32.mrf.mxu1  ;;  %v1654_v7 = vadd.f32 %v5033_v55, %v1466_v58  ;;  %v1876_v9 = vadd.f32 %v5035_v46, %v1641_v26  ;;  %v4890_v11 = vld [vmem:[%s5006_s2] ss:$0 sm:$0xff]  ;;  %v5038_v6 = vld [vmem:[#allocation20_spill] sm:$0xff] }
 0x1db   : > { %v1835_v2 = vpop.f32.mrf.mxu0  ;;  %v1883_v25 = vadd.f32 %v3365_v19, %v1648_v47  ;;  %v1879_v34 = vadd.f32 %v5038_v6, %v1644_v40 }
 0x1dc   : > { %v2020_v54 = vpop.f32.mrf.mxu1  ;;  %v1882_v24 = vadd.f32 %v1835_v2, %v1647_v39  ;;  %v5040_v39 = vld [vmem:[#allocation22_spill] sm:$0xff] }
 0x1dd   : > { %v2068_v52 = vadd.f32 %v3421_v60, %v1883_v25  ;;  %v5037_v60 = vld [vmem:[#allocation17_spill] sm:$0xff] }
 0x1de   : > { %v2062_v22 = vadd.f32 %v5037_v60, %v1877_v56 }
 0x1df   : > { %v3368_v4 = vpop.f32.mrf.mxu0 }
 0x1e0   : > { %v3424_v14 = vpop.f32.mrf.mxu1  ;;  %v1885_v36 = vadd.f32 %v3368_v4, %v1650_v42 }
 0x1e1   : > { %v1845_v59 = vpop.f32.mrf.mxu0 }
 0x1e2   : > { %v4843_v10 = vpop.f32.mrf.mxu1  ;;  %v2070_v35 = vadd.f32 %v3424_v14, %v1885_v36 }
 0x1e3   : > { %5028 = vst [vmem:[#allocation28_spill] sm:$0xff] %v4843_v10  ;;  %v1640_v10 = vadd.f32 %v4789_v27, %v1452_v43  ;;  %v1461_v27 = vadd.f32 %v1422_v51, %v4778_v23  ;;  %v5031_v51 = vld [vmem:[#allocation12_spill] sm:$0xff]  ;;  %v2067_v43 = vadd.f32 %v2020_v54, %v1882_v24  ;;  %v2061_v54 = vadd.f32 %v5039_v29, %v1876_v9 }
 0x1e4   : > { %v1651_v57 = vadd.f32 %v5031_v51, %v1463_v5 }
 0x1e5   : > { %v3371_v31 = vpop.f32.mrf.mxu0  ;;  %v1875_v20 = vadd.f32 %v3353_v1, %v1640_v10  ;;  %v1649_v62 = vadd.f32 %v5029_v37, %v1461_v27  ;;  %v1653_v1 = vadd.f32 %v5034_v3, %v1465_v45  ;;  %v2059_v10 = vadd.f32 %v5036_v18, %v1874_v49  ;;  %v5042_v45 = vld [vmem:[#allocation21_spill] sm:$0xff] }
 0x1e6   : > { %v4847_v13 = vpop.f32.mrf.mxu1  ;;  %v1878_v27 = vadd.f32 %v5040_v39, %v1643_v21  ;;  %v2064_v49 = vadd.f32 %v5042_v45, %v1879_v34  ;;  %v5043_v21 = vld [vmem:[#allocation24_spill] sm:$0xff] }
 0x1e7   : > { %v1855_v8 = vpop.f32.mrf.mxu0  ;;  %v2060_v28 = vadd.f32 %v5032_v0, %v1875_v20  ;;  %v1884_v19 = vadd.f32 %v1845_v59, %v1649_v62  ;;  %v1887_v59 = vadd.f32 %v3371_v31, %v1652_v32  ;;  %v1881_v24 = vadd.f32 %v5043_v21, %v1646_v15  ;;  %v5045_v15 = vld [vmem:[#allocation26_spill] sm:$0xff] }
 0x1e8   : > { %v4853_v63 = vpop.f32.mrf.mxu1  ;;  %v1886_v20 = vadd.f32 %v1855_v8, %v1651_v57  ;;  %v5044_v57 = vld [vmem:[#allocation23_spill] sm:$0xff] }
 0x1e9   : > { %v2072_v37 = vadd.f32 %v4847_v13, %v1887_v59  ;;  %v2063_v0 = vadd.f32 %v5044_v57, %v1878_v27 }
 0x1ea   : > { %v5041_v50 = vld [vmem:[#allocation28_spill] sm:$0xff]  ;;  %v2071_v13 = vadd.f32 %v4853_v63, %v1886_v20 }
 0x1eb   : > { %v3374_v12 = vpop.f32.mrf.mxu0  ;;  %v2069_v5 = vadd.f32 %v5041_v50, %v1884_v19  ;;  %v5046_v19 = vld [vmem:[#allocation25_spill] sm:$0xff] }
 0x1ec   : > { %v4865_v38 = vpop.f32.mrf.mxu1  ;;  %v1889_v8 = vadd.f32 %v3374_v12, %v1654_v7 }
 0x1ed   : > { %v4873_v44 = vpop.f32.mrf.mxu0 }
 0x1ee   : > { %v4875_v23 = vpop.f32.mrf.mxu1  ;;  %v1888_v12 = vadd.f32 %v4873_v44, %v1653_v1 }
 0x1f1   : > { %v3465_v2 = vpop.f32.mrf.mxu0 }
 0x1f2   : > { %v3477_v4 = vpop.f32.mrf.mxu1  ;;  %v2245_v17 = vadd.f32 %v3465_v2, %v2060_v28  ;;  %v1880_v28 = vadd.f32 %v5045_v15, %v1645_v61  ;;  %v2066_v2 = vadd.f32 %v5046_v19, %v1881_v24  ;;  %v2074_v61 = vadd.f32 %v4865_v38, %v1889_v8 }
 0x1f3   : > { %v2253_v30 = vadd.f32 %v3477_v4, %v2068_v52  ;;  %v2165_v33 = vpop.f32.mrf.mxu0 }
 0x1f4   : > { %v2205_v16 = vpop.f32.mrf.mxu1  ;;  %v2268_v41 = vadd.f32 %v4890_v11, %v2245_v17  ;;  %v2244_v47 = vadd.f32 %v2165_v33, %v2059_v10 }
 0x1f5   : > { %v2276_v48 = vadd.f32 %v4890_v11, %v2253_v30  ;;  %v2252_v26 = vadd.f32 %v2205_v16, %v2067_v43  ;;  %v3468_v25 = vpop.f32.mrf.mxu0  ;;  %v5047_v43 = vld [vmem:[#allocation27_spill] sm:$0xff]  ;;  %v2073_v30 = vadd.f32 %v4875_v23, %v1888_v12 }
 0x1f6   : > { %v3480_v14 = vpop.f32.mrf.mxu1  ;;  %2284 = vst [vmem:[%s3795_s11 + $0x8] sm:$0xff] %v2268_v41  ;;  %v2267_v31 = vadd.f32 %v4890_v11, %v2244_v47  ;;  %v2247_v42 = vadd.f32 %v3468_v25, %v2062_v22  ;;  %v2065_v17 = vadd.f32 %v5047_v43, %v1880_v28 }
 0x1f7   : > { %2292 = vst [vmem:[%s3795_s11 + $0x48] sm:$0xff] %v2276_v48  ;;  %v2275_v40 = vadd.f32 %v4890_v11, %v2252_v26  ;;  %v2255_v58 = vadd.f32 %v3480_v14, %v2070_v35  ;;  %v2175_v62 = vpop.f32.mrf.mxu0 }
 0x1f8   : > { %v2215_v56 = vpop.f32.mrf.mxu1  ;;  %2283 = vst [vmem:[%s3795_s11] sm:$0xff] %v2267_v31  ;;  %v2270_v36 = vadd.f32 %v4890_v11, %v2247_v42  ;;  %v2246_v32 = vadd.f32 %v2175_v62, %v2061_v54 }
 0x1f9   : > { %2291 = vst [vmem:[%s3795_s11 + $0x40] sm:$0xff] %v2275_v40  ;;  %v2278_v53 = vadd.f32 %v4890_v11, %v2255_v58  ;;  %v2254_v51 = vadd.f32 %v2215_v56, %v2069_v5  ;;  %v3471_v52 = vpop.f32.mrf.mxu0 }
 0x1fa   : > { %v3483_v55 = vpop.f32.mrf.mxu1  ;;  %2286 = vst [vmem:[%s3795_s11 + $0x18] sm:$0xff] %v2270_v36  ;;  %v2269_v7 = vadd.f32 %v4890_v11, %v2246_v32  ;;  %v2249_v46 = vadd.f32 %v3471_v52, %v2064_v49 }
 0x1fb   : > { %2294 = vst [vmem:[%s3795_s11 + $0x58] sm:$0xff] %v2278_v53  ;;  %v2277_v3 = vadd.f32 %v4890_v11, %v2254_v51  ;;  %v2257_v9 = vadd.f32 %v3483_v55, %v2072_v37  ;;  %v2185_v63 = vpop.f32.mrf.mxu0 }
 0x1fc   : > { %v2225_v4 = vpop.f32.mrf.mxu1  ;;  %2285 = vst [vmem:[%s3795_s11 + $0x10] sm:$0xff] %v2269_v7  ;;  %v2272_v44 = vadd.f32 %v4890_v11, %v2249_v46  ;;  %v2248_v18 = vadd.f32 %v2185_v63, %v2063_v0 }
 0x1fd   : > { %2293 = vst [vmem:[%s3795_s11 + $0x50] sm:$0xff] %v2277_v3  ;;  %v2280_v1 = vadd.f32 %v4890_v11, %v2257_v9  ;;  %v2256_v10 = vadd.f32 %v2225_v4, %v2071_v13  ;;  %v3474_v60 = vpop.f32.mrf.mxu0 }
 0x1fe   : > { %v3486_v38 = vpop.f32.mrf.mxu1  ;;  %2288 = vst [vmem:[%s3795_s11 + $0x28] sm:$0xff] %v2272_v44  ;;  %v2271_v22 = vadd.f32 %v4890_v11, %v2248_v18  ;;  %v2251_v34 = vadd.f32 %v3474_v60, %v2066_v2 }
 0x1ff   : > { %2296 = vst [vmem:[%s3795_s11 + $0x68] sm:$0xff] %v2280_v1  ;;  %v2279_v6 = vadd.f32 %v4890_v11, %v2256_v10  ;;  %v2259_v35 = vadd.f32 %v3486_v38, %v2074_v61  ;;  %v2195_v59 = vpop.f32.mrf.mxu0 }
 0x200   : > { %v2235_v33 = vpop.f32.mrf.mxu1  ;;  %2287 = vst [vmem:[%s3795_s11 + $0x20] sm:$0xff] %v2271_v22  ;;  %v2274_v23 = vadd.f32 %v4890_v11, %v2251_v34  ;;  %v2250_v41 = vadd.f32 %v2195_v59, %v2065_v17 }
 0x201   : > { %2295 = vst [vmem:[%s3795_s11 + $0x60] sm:$0xff] %v2279_v6  ;;  %v2282_v16 = vadd.f32 %v4890_v11, %v2259_v35  ;;  %v2258_v48 = vadd.f32 %v2235_v33, %v2073_v30 }
 0x202   : > { %2290 = vst [vmem:[%s3795_s11 + $0x38] sm:$0xff] %v2274_v23  ;;  %v2273_v47 = vadd.f32 %v4890_v11, %v2250_v41 }
 0x203   : > { %2298 = vst [vmem:[%s3795_s11 + $0x78] sm:$0xff] %v2282_v16  ;;  %v2281_v26 = vadd.f32 %v4890_v11, %v2258_v48 }
 0x204   : > { %2289 = vst [vmem:[%s3795_s11 + $0x30] sm:$0xff] %v2273_v47 }
 0x205   : > { %2297 = vst [vmem:[%s3795_s11 + $0x70] sm:$0xff] %v2281_v26 }
 0x206   : > { %3609 = shalt.err (!%p3606_p10)
}
 0x207   : > { %s3610_s4 = scalar_lea.hbm %s4941_s7, 2048  ;;  %s3614_s10 = scalar_lea.hbm %s5007_s3, 8192 }
 0x208   : > { %p3611_p11 = scmp.ne.s32.totalorder %s4941_s7, %s3610_s4  ;;  %p3615_p0 = scmp.lt.s32.totalorder %s4941_s7, %s5007_s3 }
 0x209   : > { %p3616_p1 = scmp.lt.s32.totalorder %s3614_s10, %s3610_s4 }
 0x20a   : > { %p3612_p12 = pnand %p3611_p11, %p3766_p3 }
 0x20b   : > { %p3617_p2 = por %p3616_p1, %p3615_p0 }
 0x20c   : > { %p3613_p13 = pneg %p3612_p12 }
 0x20e   : > { %p3618_p4 = pnand %p3617_p2, %p3613_p13 }
 0x210   : > { %3621 = shalt.err (!%p3618_p4)
}
 0x211   : > { %s3693_s16 = smov 128   ;;  %s3694_s9 = smov 8  }
 0x212   : > { %3519 = dma.vmem_to_hbm [thread:$0]  (%p3766_p3), %s4943_s29, 2048, %s4941_s7, %s4953_s5, %s3693_s16, %s3693_s16, %s3694_s9  }
 0x213 PF: > { %p3525_p5 = scmp.ge.s32.totalorder %s3690_s19, 2  ;;  %s2331_s6 = sand.u32 1, %s3662_s12  }
 0x214   : > { %s2332_s20 = scalar_lea.sflag [#allocation5], %s2331_s6 }
 0x215   : > { %p3522_p6 = pnand %p3525_p5, %p3775_p8 }
 0x217   : > { %p3523_p7 = pneg %p3522_p6 }
 0x219   : > { %3657 = dma.done.wait (%p3523_p7), %s2332_s20, 2048  }
 0x21a   : > { %3659 = vsyncadd (%p3523_p7), %s2332_s20, 4294965248  ;;  %s16_s19 = sadd.s32 1, %s3690_s19   ;;  %s5048_s12 = smov %s3666_s13 }
 0x21b   : > { %p13_p9 = scmp.ge.s32.totalorder %s16_s19, 6   ;;  %s5049_s13 = smov %s3670_s14 }
 0x21c   : > { %s5050_s14 = smov %s3784_s30  ;;  %s5051_s15 = smov %s3682_s17 }
 0x21d   : > { %s5052_s16 = smov %s3686_s18  ;;  %s5053_s17 = smov %s5056_s22 }
 0x21e   : > { %s5054_s18 = smov %s5060_s23  ;;  %15 = sbr.rel (!%p13_p9) target bundleno = 5 (0x5), region = 197 }
 0x223   :  { %2337 = vsyncpa [#allocation5], 1 }
 0x224   :  { %2339 = vsyncpa [#allocation5 + $0x1], 1 }
 0x225   :  { %2340 = vsyncmov [#allocation3] }
 0x228   :  { %s2341_s25 = vpop.sfrf %2340 }
 0x229   :  { %p2691_p3 = scmp.ne.s32.totalorder %s2341_s25, 0 }
 0x22b   :  { %2345 = shalt.err (%p2691_p3)  }
 0x22c   :  { %2347 = vsyncmov [#allocation3 + $0x1] }
 0x22f   :  { %s2348_s26 = vpop.sfrf %2347 }
 0x230   :  { %p2692_p8 = scmp.ne.s32.totalorder %s2348_s26, 0 }
 0x232   :  { %2352 = shalt.err (%p2692_p8)  }

</bundles_post_ra>
